<compile_context>
chip_gen: v7x
topology: tpu7x:2x2x1
jax: 0.10.0
libtpu: 0.0.40
codegen_flags: <defaults>
</compile_context>

<pallas_src>
import numpy as np
import jax
import jax.numpy as jnp
from jax.experimental import pallas as pl
from jax.experimental.pallas import tpu as pltpu


def ffm_kernel(x_ref, w1_ref, w2_ref, b1_ref, b2_ref, alpha_ref, beta_ref,
               fwd_ref, inv_ref, o_ref):
    # x_ref : (1, R, P)   R = bt*C channel maps, P = H*W lanes (lane-dense)
    # w*_ref: (R, R)      block-diagonal 1x1-conv weights  kron(I_bt, W)
    # b*/alpha/beta: (R, 1)
    # fwd_ref: (P, 2P)    flattened 2-D DFT,  [cos | -sin]
    # inv_ref: (2P, 2P)   inverse DFT,  [[cos, sin], [-sin, cos]] / P
    P = x_ref.shape[2]
    xr = x_ref[0].astype(jnp.float32)                                       # (R, P)

    # ---- both 1x1 convs: two MXU matmuls (no row slicing afterwards) ------
    x1 = jnp.dot(w1_ref[...], xr, preferred_element_type=jnp.float32) + b1_ref[...]
    x2 = jnp.dot(w2_ref[...], xr, preferred_element_type=jnp.float32) + b2_ref[...]

    # ---- fft2(x2): one matmul, [real | imag] along lanes -------------------
    freq = jnp.dot(x2, fwd_ref[...], preferred_element_type=jnp.float32)    # (R, 2P)

    # ---- complex multiply by real x1 (lane-aligned tile of two P slabs) ----
    prod = freq * jnp.concatenate([x1, x1], axis=1)                         # (R, 2P)

    # ---- ifft2: one matmul -> [real | imag] pixels (1/P folded into inv) ---
    pix = jnp.dot(prod, inv_ref[...], preferred_element_type=jnp.float32)   # (R, 2P)
    pr = pix[:, :P]
    pi = pix[:, P:]
    mag = jnp.sqrt(pr * pr + pi * pi)                                       # (R, P)

    # ---- magnitude + residual blend, lane-dense (R, P) store ---------------
    o_ref[0] = (mag * alpha_ref[...] + xr * beta_ref[...]).astype(o_ref.dtype)


def _dft2_twiddles(H, W):
    # Flattened 2-D DFT twiddles (row index p = h*W + w, col index q = u*W + v),
    # built in float64 then cast to f32 (no int32 modular-product overflow).
    P = H * W
    ang_h = 2.0 * np.pi * np.outer(np.arange(H), np.arange(H)) / H          # (H, H)
    ang_w = 2.0 * np.pi * np.outer(np.arange(W), np.arange(W)) / W          # (W, W)
    ang = (ang_h[:, None, :, None] + ang_w[None, :, None, :]).reshape(P, P)
    c = np.cos(ang)
    s = np.sin(ang)
    fwd = np.concatenate([c, -s], axis=1)                                   # (P, 2P)
    inv = np.concatenate([np.concatenate([c, s], axis=1),
                          np.concatenate([-s, c], axis=1)], axis=0) / P     # (2P, 2P)
    return jnp.asarray(fwd, jnp.float32), jnp.asarray(inv, jnp.float32)


def _pick_bt(B, C, P, budget_bytes):
    # Batch elements folded per grid step.  Constraints:
    #  * bt divides B; keep >= 2 grid steps when B >= 2 (v7x megacore)
    #  * R = bt*C <= P so kron(I_bt, W) zero-FLOPs stay a minority vs DFT work
    #  * twiddles + weights + double-buffered io + live f32 temps fit budget
    #    (budget sized against v7x's 64 MiB physical VMEM).
    def fits(bt):
        R = bt * C
        need = 24 * P * P + 8 * R * R + 64 * R * P + (1 << 20)
        return need <= budget_bytes and R <= max(C, P)

    best = 1
    for bt in range(1, B + 1):
        if B % bt:
            continue
        if B >= 2 and bt > B // 2:
            continue
        if fits(bt):
            best = bt
    return best


def ffm_pallas(x, w1, b1, w2, b2, alpha, beta, *,
               vmem_budget_bytes=36 * 1024 * 1024):
    B, C, H, W = x.shape
    P = H * W
    if P > 1024:
        # TODO(synk): separable (per-axis) DFT path for large feature maps; the
        # fused 2-D twiddles (24*P^2 bytes) no longer fit VMEM beyond ~32x32.
        raise NotImplementedError("ffm_pallas fused-DFT path requires H*W <= 1024")

    f32 = jnp.float32
    bt = _pick_bt(B, C, P, vmem_budget_bytes)
    R = bt * C
    G = B // bt

    fwd, inv = _dft2_twiddles(H, W)

    # Fold bt batch elements into the row dim: block-diagonal 1x1-conv weights.
    eye_bt = jnp.eye(bt, dtype=f32)
    w1_big = jnp.kron(eye_bt, w1.astype(f32))                  # (R, R)
    w2_big = jnp.kron(eye_bt, w2.astype(f32))                  # (R, R)
    b1_big = jnp.tile(b1.astype(f32), bt)[:, None]             # (R, 1)
    b2_big = jnp.tile(b2.astype(f32), bt)[:, None]             # (R, 1)
    alpha_v = jnp.tile(alpha.astype(f32), bt)[:, None]         # (R, 1)
    beta_v = jnp.tile(beta.astype(f32), bt)[:, None]           # (R, 1)

    x3 = x.reshape(G, R, P)                                    # contiguous reshape

    def const_spec(shape):
        # Constant index map -> block index never changes, so Pallas keeps the
        # operand resident in VMEM instead of re-DMAing it every grid step.
        return pl.BlockSpec(shape, lambda i: (0,) * len(shape))

    out3 = pl.pallas_call(
        ffm_kernel,
        out_shape=jax.ShapeDtypeStruct((G, R, P), x.dtype),
        grid_spec=pltpu.PrefetchScalarGridSpec(
            num_scalar_prefetch=0,
            grid=(G,),
            in_specs=[
                pl.BlockSpec((1, R, P), lambda i: (i, 0, 0)),   # x
                const_spec((R, R)),                             # w1_big
                const_spec((R, R)),                             # w2_big
                const_spec((R, 1)),                             # b1
                const_spec((R, 1)),                             # b2
                const_spec((R, 1)),                             # alpha
                const_spec((R, 1)),                             # beta
                const_spec((P, 2 * P)),                         # fwd DFT
                const_spec((2 * P, 2 * P)),                     # inv DFT
            ],
            out_specs=pl.BlockSpec((1, R, P), lambda i: (i, 0, 0)),
        ),
        compiler_params=pltpu.CompilerParams(
            dimension_semantics=("parallel",),
            vmem_limit_bytes=48 * 1024 * 1024,
        ),
    )(x3, w1_big, w2_big, b1_big, b2_big, alpha_v, beta_v, fwd, inv)

    return out3.reshape(B, C, H, W)


def ffm_reference(x, w1, b1, w2, b2, alpha, beta):
    # Pure numpy reference mirroring the PyTorch forward (float64).
    x = np.asarray(x, np.float64)
    w1 = np.asarray(w1, np.float64)
    b1 = np.asarray(b1, np.float64)
    w2 = np.asarray(w2, np.float64)
    b2 = np.asarray(b2, np.float64)
    alpha = np.asarray(alpha, np.float64)
    beta = np.asarray(beta, np.float64)
    x1 = np.einsum('oc,bchw->bohw', w1, x) + b1[None, :, None, None]
    x2 = np.einsum('oc,bchw->bohw', w2, x) + b2[None, :, None, None]
    x2f = np.fft.fft2(x2, axes=(-2, -1))          # norm='backward'
    out = x1 * x2f
    out = np.fft.ifft2(out, axes=(-2, -1))        # norm='backward'
    out = np.abs(out)
    return out * alpha[None, :, None, None] + x * beta[None, :, None, None]


if __name__ == "__main__":
    B, C, H, W = 2, 4, 16, 16   # dim = 4
    key = jax.random.PRNGKey(0)
    ks = jax.random.split(key, 7)
    x = jax.random.normal(ks[0], (B, C, H, W), jnp.float32)

    # Deterministic synthetic parameters (shapes follow FFM.__init__; torch's
    # defaults alpha=0/beta=1 would make the output trivially equal x, so use
    # small random values to actually exercise the FFT path).
    w1 = 0.2 * jax.random.normal(ks[1], (C, C), jnp.float32)    # dwconv1 1x1
    b1 = 0.1 * jax.random.normal(ks[2], (C,), jnp.float32)
    w2 = 0.2 * jax.random.normal(ks[3], (C, C), jnp.float32)    # dwconv2 1x1
    b2 = 0.1 * jax.random.normal(ks[4], (C,), jnp.float32)
    alpha = 0.5 * jax.random.normal(ks[5], (C,), jnp.float32)
    beta = 1.0 + 0.1 * jax.random.normal(ks[6], (C,), jnp.float32)

    out = ffm_pallas(x, w1, b1, w2, b2, alpha, beta)
    out = jax.block_until_ready(out)

    ref = ffm_reference(x, w1, b1, w2, b2, alpha, beta)
    assert out.shape == (B, C, H, W)
    np.testing.assert_allclose(np.asarray(out), ref, rtol=2e-3, atol=2e-3)
    print("KERNEL_OK")
</pallas_src>

<mosaic_0001>
module attributes {stable_mosaic.version = 11 : i64} {
  func.func @ffm_kernel(%arg0: i32, %arg1: memref<1x4x256xf32, #tpu.memory_space<vmem>>, %arg2: memref<4x4xf32, #tpu.memory_space<vmem>>, %arg3: memref<4x4xf32, #tpu.memory_space<vmem>>, %arg4: memref<4x1xf32, #tpu.memory_space<vmem>>, %arg5: memref<4x1xf32, #tpu.memory_space<vmem>>, %arg6: memref<4x1xf32, #tpu.memory_space<vmem>>, %arg7: memref<4x1xf32, #tpu.memory_space<vmem>>, %arg8: memref<256x512xf32, #tpu.memory_space<vmem>>, %arg9: memref<512x512xf32, #tpu.memory_space<vmem>>, %arg10: memref<1x4x256xf32, #tpu.memory_space<vmem>>) attributes {dimension_semantics = [#tpu.dimension_semantics<parallel>], iteration_bounds = array<i64: 2>, scalar_prefetch = 0 : i64, scratch_operands = 0 : i64, tpu.core_type = #tpu.core_type<tc>, window_params = [{transform_indices = @transform_0, window_bounds = array<i64: 1, 4, 256>}, {pipeline_mode = #tpu.pipeline_mode<synchronous>, transform_indices = @transform_1, window_bounds = array<i64: 4, 4>}, {pipeline_mode = #tpu.pipeline_mode<synchronous>, transform_indices = @transform_2, window_bounds = array<i64: 4, 4>}, {pipeline_mode = #tpu.pipeline_mode<synchronous>, transform_indices = @transform_3, window_bounds = array<i64: 4, 1>}, {pipeline_mode = #tpu.pipeline_mode<synchronous>, transform_indices = @transform_4, window_bounds = array<i64: 4, 1>}, {pipeline_mode = #tpu.pipeline_mode<synchronous>, transform_indices = @transform_5, window_bounds = array<i64: 4, 1>}, {pipeline_mode = #tpu.pipeline_mode<synchronous>, transform_indices = @transform_6, window_bounds = array<i64: 4, 1>}, {pipeline_mode = #tpu.pipeline_mode<synchronous>, transform_indices = @transform_7, window_bounds = array<i64: 256, 512>}, {pipeline_mode = #tpu.pipeline_mode<synchronous>, transform_indices = @transform_8, window_bounds = array<i64: 512, 512>}, {transform_indices = @transform_9, window_bounds = array<i64: 1, 4, 256>}]} {
    %c0 = arith.constant 0 : index
    %c0_0 = arith.constant 0 : index
    %c0_1 = arith.constant 0 : index
    %0 = vector.load %arg1[%c0, %c0_0, %c0_1] : memref<1x4x256xf32, #tpu.memory_space<vmem>>, vector<1x4x256xf32>
    %1 = vector.shape_cast %0 : vector<1x4x256xf32> to vector<4x256xf32>
    %c0_2 = arith.constant 0 : index
    %c0_3 = arith.constant 0 : index
    %2 = vector.load %arg2[%c0_2, %c0_3] : memref<4x4xf32, #tpu.memory_space<vmem>>, vector<4x4xf32>
    %cst = arith.constant dense<0.000000e+00> : vector<4x256xf32>
    %3 = tpu.matmul %2, %1, %cst {dimension_numbers = #tpu.dot_dimension_numbers<[1], [0], [0], [1], [0, 0, 1, 1], [], []>} : vector<4x4xf32>, vector<4x256xf32>, vector<4x256xf32> -> vector<4x256xf32>
    %c0_4 = arith.constant 0 : index
    %c0_5 = arith.constant 0 : index
    %4 = vector.load %arg4[%c0_4, %c0_5] : memref<4x1xf32, #tpu.memory_space<vmem>>, vector<4x1xf32>
    %5 = vector.broadcast %4 : vector<4x1xf32> to vector<4x256xf32>
    %6 = arith.addf %3, %5 : vector<4x256xf32>
    %c0_6 = arith.constant 0 : index
    %c0_7 = arith.constant 0 : index
    %7 = vector.load %arg3[%c0_6, %c0_7] : memref<4x4xf32, #tpu.memory_space<vmem>>, vector<4x4xf32>
    %cst_8 = arith.constant dense<0.000000e+00> : vector<4x256xf32>
    %8 = tpu.matmul %7, %1, %cst_8 {dimension_numbers = #tpu.dot_dimension_numbers<[1], [0], [0], [1], [0, 0, 1, 1], [], []>} : vector<4x4xf32>, vector<4x256xf32>, vector<4x256xf32> -> vector<4x256xf32>
    %c0_9 = arith.constant 0 : index
    %c0_10 = arith.constant 0 : index
    %9 = vector.load %arg5[%c0_9, %c0_10] : memref<4x1xf32, #tpu.memory_space<vmem>>, vector<4x1xf32>
    %10 = vector.broadcast %9 : vector<4x1xf32> to vector<4x256xf32>
    %11 = arith.addf %8, %10 : vector<4x256xf32>
    %c0_11 = arith.constant 0 : index
    %c0_12 = arith.constant 0 : index
    %12 = vector.load %arg8[%c0_11, %c0_12] : memref<256x512xf32, #tpu.memory_space<vmem>>, vector<256x512xf32>
    %cst_13 = arith.constant dense<0.000000e+00> : vector<4x512xf32>
    %13 = tpu.matmul %11, %12, %cst_13 {dimension_numbers = #tpu.dot_dimension_numbers<[1], [0], [0], [1], [0, 0, 1, 1], [], []>} : vector<4x256xf32>, vector<256x512xf32>, vector<4x512xf32> -> vector<4x512xf32>
    %14 = tpu.concatenate %6, %6 in 1 : vector<4x256xf32>, vector<4x256xf32> -> vector<4x512xf32>
    %15 = arith.mulf %13, %14 : vector<4x512xf32>
    %c0_14 = arith.constant 0 : index
    %c0_15 = arith.constant 0 : index
    %16 = vector.load %arg9[%c0_14, %c0_15] : memref<512x512xf32, #tpu.memory_space<vmem>>, vector<512x512xf32>
    %cst_16 = arith.constant dense<0.000000e+00> : vector<4x512xf32>
    %17 = tpu.matmul %15, %16, %cst_16 {dimension_numbers = #tpu.dot_dimension_numbers<[1], [0], [0], [1], [0, 0, 1, 1], [], []>} : vector<4x512xf32>, vector<512x512xf32>, vector<4x512xf32> -> vector<4x512xf32>
    %18 = vector.extract_strided_slice %17 {offsets = [0, 0], sizes = [4, 256], strides = [1, 1]} : vector<4x512xf32> to vector<4x256xf32>
    %19 = vector.extract_strided_slice %17 {offsets = [0, 256], sizes = [4, 256], strides = [1, 1]} : vector<4x512xf32> to vector<4x256xf32>
    %20 = arith.mulf %18, %18 : vector<4x256xf32>
    %21 = arith.mulf %19, %19 : vector<4x256xf32>
    %22 = arith.addf %20, %21 : vector<4x256xf32>
    %23 = math.sqrt %22 : vector<4x256xf32>
    %c0_17 = arith.constant 0 : index
    %c0_18 = arith.constant 0 : index
    %24 = vector.load %arg6[%c0_17, %c0_18] : memref<4x1xf32, #tpu.memory_space<vmem>>, vector<4x1xf32>
    %25 = vector.broadcast %24 : vector<4x1xf32> to vector<4x256xf32>
    %26 = arith.mulf %23, %25 : vector<4x256xf32>
    %c0_19 = arith.constant 0 : index
    %c0_20 = arith.constant 0 : index
    %27 = vector.load %arg7[%c0_19, %c0_20] : memref<4x1xf32, #tpu.memory_space<vmem>>, vector<4x1xf32>
    %28 = vector.broadcast %27 : vector<4x1xf32> to vector<4x256xf32>
    %29 = arith.mulf %1, %28 : vector<4x256xf32>
    %30 = arith.addf %26, %29 : vector<4x256xf32>
    %c0_21 = arith.constant 0 : index
    %c0_22 = arith.constant 0 : index
    %c0_23 = arith.constant 0 : index
    %31 = vector.load %arg10[%c0_21, %c0_22, %c0_23] : memref<1x4x256xf32, #tpu.memory_space<vmem>>, vector<1x4x256xf32>
    %32 = vector.shape_cast %31 : vector<1x4x256xf32> to vector<4x256xf32>
    %33 = vector.shape_cast %30 : vector<4x256xf32> to vector<1x4x256xf32>
    tpu.vector_store %arg10[%c0_21, %c0_22, %c0_23], %33 {strides = array<i32>} : memref<1x4x256xf32, #tpu.memory_space<vmem>>, vector<1x4x256xf32>,
    return
  }
  func.func @transform_0(%arg0: i32) -> (i32, i32, i32) {
    %c0_i32 = arith.constant 0 : i32
    %c0_i32_0 = arith.constant 0 : i32
    %c0_i32_1 = arith.constant 0 : i32
    return %arg0, %c0_i32, %c0_i32_0 : i32, i32, i32
  }
  func.func @transform_1(%arg0: i32) -> (i32, i32) {
    %c0_i32 = arith.constant 0 : i32
    %c0_i32_0 = arith.constant 0 : i32
    %c0_i32_1 = arith.constant 0 : i32
    return %c0_i32, %c0_i32_0 : i32, i32
  }
  func.func @transform_2(%arg0: i32) -> (i32, i32) {
    %c0_i32 = arith.constant 0 : i32
    %c0_i32_0 = arith.constant 0 : i32
    %c0_i32_1 = arith.constant 0 : i32
    return %c0_i32, %c0_i32_0 : i32, i32
  }
  func.func @transform_3(%arg0: i32) -> (i32, i32) {
    %c0_i32 = arith.constant 0 : i32
    %c0_i32_0 = arith.constant 0 : i32
    %c0_i32_1 = arith.constant 0 : i32
    return %c0_i32, %c0_i32_0 : i32, i32
  }
  func.func @transform_4(%arg0: i32) -> (i32, i32) {
    %c0_i32 = arith.constant 0 : i32
    %c0_i32_0 = arith.constant 0 : i32
    %c0_i32_1 = arith.constant 0 : i32
    return %c0_i32, %c0_i32_0 : i32, i32
  }
  func.func @transform_5(%arg0: i32) -> (i32, i32) {
    %c0_i32 = arith.constant 0 : i32
    %c0_i32_0 = arith.constant 0 : i32
    %c0_i32_1 = arith.constant 0 : i32
    return %c0_i32, %c0_i32_0 : i32, i32
  }
  func.func @transform_6(%arg0: i32) -> (i32, i32) {
    %c0_i32 = arith.constant 0 : i32
    %c0_i32_0 = arith.constant 0 : i32
    %c0_i32_1 = arith.constant 0 : i32
    return %c0_i32, %c0_i32_0 : i32, i32
  }
  func.func @transform_7(%arg0: i32) -> (i32, i32) {
    %c0_i32 = arith.constant 0 : i32
    %c0_i32_0 = arith.constant 0 : i32
    %c0_i32_1 = arith.constant 0 : i32
    return %c0_i32, %c0_i32_0 : i32, i32
  }
  func.func @transform_8(%arg0: i32) -> (i32, i32) {
    %c0_i32 = arith.constant 0 : i32
    %c0_i32_0 = arith.constant 0 : i32
    %c0_i32_1 = arith.constant 0 : i32
    return %c0_i32, %c0_i32_0 : i32, i32
  }
  func.func @transform_9(%arg0: i32) -> (i32, i32, i32) {
    %c0_i32 = arith.constant 0 : i32
    %c0_i32_0 = arith.constant 0 : i32
    %c0_i32_1 = arith.constant 0 : i32
    return %arg0, %c0_i32, %c0_i32_0 : i32, i32, i32
  }
}

</mosaic_0001>

<bundles_post_ra>
// kernel: tpu_custom_call.1
= control target key start
LH: loop header
LB: loop body
LE: loop exit
PB: predicated region body
PF: predicated region fallthrough
CT: control target
= control target key end

     0   :  { %14 = vsyncpa [#allocation3], 0  ;;  %s2379_s0 = inlined_call_operand.vmem [shape: f32[2,4,256], index: 0, kind: input, shape index: {}]   ;;  %s2380_s1 = inlined_call_operand.vmem [shape: f32[4,4], index: 1, kind: input, shape index: {}]   ;;  %s2381_s2 = inlined_call_operand.vmem [shape: f32[4,4], index: 2, kind: input, shape index: {}]   ;;  %s2382_s3 = inlined_call_operand.vmem [shape: f32[4,1], index: 3, kind: input, shape index: {}]   ;;  %s2383_s4 = inlined_call_operand.vmem [shape: f32[4,1], index: 4, kind: input, shape index: {}]   ;;  %s2384_s5 = inlined_call_operand.vmem [shape: f32[4,1], index: 5, kind: input, shape index: {}]   ;;  %s2385_s6 = inlined_call_operand.vmem [shape: f32[4,1], index: 6, kind: input, shape index: {}]   ;;  %s2386_s7 = inlined_call_operand.hbm [shape: f32[256,512], index: 7, kind: input, shape index: {}]   ;;  %s2387_s8 = inlined_call_operand.hbm [shape: f32[512,512], index: 8, kind: input, shape index: {}]   ;;  %s2388_s9 = inlined_call_operand.hbm [shape: f32[2,4,256], index: 9, kind: output, shape index: {}]  }
   0x1   :  { %15 = vsyncpa [#allocation6], 0 }
   0x2   :  { %16 = vsyncpa [#allocation4], 0 }
   0x3   :  { %18 = vsyncpa [#allocation4 + $0x1], 0  ;;  %s2165_s30 = smov 0   ;;  %s2167_s10 = smov 0  }
   0x4   :  { %s2169_s11 = smov 0   ;;  %s2171_s12 = smov 0  }
   0x5 LB: > { %2395 = sst [smem:[#allocation11_spill]] %s2101_s11  ;;  %s2186_s13 = sadd.s32 4294967295, %s2105_s12   ;;  %s2105_s12 = sphi %s2171_s12, %s2409_s12   ;;  %s2101_s11 = sphi %s2169_s11, %s2411_s11   ;;  %s2097_s10 = sphi %s2167_s10, %s2413_s10   ;;  %s2093_s30 = sphi %s2165_s30, %s2412_s30  }
   0x6   : > { %s1494_s14 = sadd.s32 4294967294, %s2105_s12   ;;  %s2190_s15 = sadd.s32 1, %s2105_s12  }
   0x7   : > { %2396 = sst [smem:[#allocation12_spill]] %s2190_s15  ;;  %s225_s16 = sadd.s32 1, %s2101_s11 }
   0x8   : > { %s222_s17 = ssub.s32 %s2105_s12, %s2190_s15  ;;  %p235_p0 = scmp.ne.s32.totalorder %s2101_s11, %s2097_s10 }
   0x9   : > { %p223_p1 = scmp.eq.s32.totalorder %s222_s17, 0  ;;  %p236_p2 = scmp.eq.s32.totalorder %s2186_s13, 1 }
   0xa   : > { %p241_p3 = scmp.ne.s32.totalorder %s2097_s10, %s2093_s30  ;;  %p242_p4 = scmp.eq.s32.totalorder %s1494_s14, 1 }
   0xb   : > { %s2201_s18 = scalar_select %p223_p1, %s2101_s11, %s225_s16  }
   0xc   : > { %p2203_p5 = por %p236_p2, %p235_p0  ;;  %p2207_p6 = por %p242_p4, %p241_p3 }
   0xd   : > { %2397 = sst [smem:[#allocation13_spill]] %s2201_s18  ;;  %p1495_p7 = scmp.ge.s32.totalorder %s2105_s12, 1 }
   0xe   : > { %s2398_s19 = scalar_select %p2203_p5, 1, 0 }
   0xf   : > { %s2399_s20 = scalar_select %p2207_p6, 1, 0 }
  0x10   : > { %p249_p8 = scmp.lt.s32.totalorder %s2105_s12, 3  ;;  %p2389_p9 = scmp.eq.s32.totalorder %s2186_s13, 0 }
  0x11   : > { %s2107_s22 = smov [#allocation2]   ;;  %s2108_s25 = smov [#allocation5]  }
  0x12   : > { %p2214_p10 = pnand %p1495_p7, %p249_p8  ;;  %s279_s23 = sshll.u32 %s2107_s22, 4  ;;  %s280_s23 = int_to_ptr.vmem [resolvable:$true] %s279_s23 }
  0x13   : > { %s292_s26 = sshll.u32 %s2108_s25, 4  ;;  %s1979_s29 = scalar_lea.hbm %s2386_s7, 16384  ;;  %s2226_s26 = int_to_ptr.vmem [resolvable:$true] %s292_s26 }
  0x14   : > { %s2400_s21 = scalar_select %p2214_p10, 1, 0 }
  0x15   : > { %p1916_p11 = pneg %p2214_p10  ;;  %p1980_p13 = scmp.ne.s32.totalorder %s2386_s7, %s1979_s29 }
  0x16   : > { %p1986_p3 = scmp.lt.u32.totalorder %s1979_s29, %s2386_s7 }
  0x17   : > { %p2222_p12 = pnand %p2389_p9, %p1916_p11 }
  0x19   : > { %p1981_p0 = pneg %p2222_p12 }
  0x1b   : > { %p1982_p1 = pnand %p1981_p0, %p1980_p13 }
  0x1d   : > { %p1983_p2 = pneg %p1982_p1 }
  0x1f   : > { %p1988_p4 = pnand %p1986_p3, %p1983_p2 }
  0x21   : > { %1991 = shalt.err (!%p1988_p4)
}
  0x22   : > { %s1992_s25 = scalar_lea.vmem %s280_s23, 16384  ;;  %p2000_p9 = scmp.lt.s32.totalorder %s280_s23, %s280_s23 }
  0x23   : > { %p1993_p7 = scmp.ne.s32.totalorder %s280_s23, %s1992_s25  ;;  %p2001_p6 = scmp.lt.s32.totalorder %s1992_s25, %s1992_s25 }
  0x25   : > { %p1995_p8 = pnand %p1993_p7, %p1981_p0  ;;  %p2002_p5 = por %p2001_p6, %p2000_p9 }
  0x27   : > { %p1996_p11 = pneg %p1995_p8 }
  0x29   : > { %p2003_p10 = pnand %p2002_p5, %p1996_p11 }
  0x2b   : > { %2006 = shalt.err (!%p2003_p10)
}
  0x2c   : > { %s2109_s27 = smov 512   ;;  %s2110_s28 = smov 32  }
  0x2d   : > { %1919 = dma.hbm_to_vmem [thread:$0]  (!%p2222_p12), %s2386_s7, 16384, %s280_s23, [#allocation3], %s2109_s27, %s2109_s27, %s2110_s28  }
  0x2e   : > { %s2007_s22 = scalar_lea.hbm %s2387_s8, 32768 }
  0x2f   : > { %p2008_p13 = scmp.ne.s32.totalorder %s2387_s8, %s2007_s22  ;;  %p2014_p9 = scmp.lt.u32.totalorder %s2007_s22, %s2387_s8 }
  0x31   : > { %p2010_p5 = pnand %p2008_p13, %p1981_p0 }
  0x33   : > { %p2011_p6 = pneg %p2010_p5 }
  0x35   : > { %p2016_p10 = pnand %p2014_p9, %p2011_p6 }
  0x37   : > { %2019 = shalt.err (!%p2016_p10)
}
  0x38   : > { %s2020_s23 = scalar_lea.vmem %s2226_s26, 32768  ;;  %p2028_p4 = scmp.lt.s32.totalorder %s2226_s26, %s2226_s26 }
  0x39   : > { %p2021_p1 = scmp.ne.s32.totalorder %s2226_s26, %s2020_s23  ;;  %p2029_p7 = scmp.lt.s32.totalorder %s2020_s23, %s2020_s23 }
  0x3b   : > { %p2023_p2 = pnand %p2021_p1, %p1981_p0  ;;  %p2030_p8 = por %p2029_p7, %p2028_p4 }
  0x3d   : > { %p2024_p3 = pneg %p2023_p2 }
  0x3f   : > { %p2031_p11 = pnand %p2030_p8, %p2024_p3 }
  0x41   : > { %2034 = shalt.err (!%p2031_p11)
}
  0x42   : > { %1922 = dma.hbm_to_vmem [thread:$0]  (!%p2222_p12), %s2387_s8, 32768, %s2226_s26, [#allocation6], %s2109_s27, %s2109_s27, %s2110_s28  }
  0x43   : > { %p2402_p13 = scmp.ne.s32.totalorder %s2400_s21, 0 }
  0x44   : > { %p2403_p5 = scmp.eq.s32.totalorder (!%p2402_p13), %s2186_s13, 0 }
  0x45   : > { %316 = sbr.rel (%p2402_p13) target bundleno = 840 (0x348), region = 56 }
  0x4c   : > { %2080 = dma.done.wait (%p2403_p5), [#allocation3], 16384   ;;  %p2404_p0 = pmov %p2403_p5 }
  0x4e   : > { %2082 = vsyncadd (%p2404_p0), [#allocation3], 4294950912  ;;  %p2405_p6 = pmov %p2404_p0 }
  0x4f   : > { %p2406_p9 = pmov %p2404_p0 }
  0x50   : > { %2084 = dma.done.wait (%p2405_p6), [#allocation6], 32768  }
  0x51   : > { %2086 = vsyncadd (%p2406_p9), [#allocation6], 4294934528  ;;  %p356_p10 = scmp.lt.s32.totalorder %s2186_s13, 1  ;;  %v2111_v0 = vmov 0.0   ;;  %v2112_v1 = vmov 0   ;;  %vm375_vm0 = vcmask 1043456  }
  0x52   : > { %444 = vmatprep.mubr.f32.mxu0 %v2111_v0  ;;  %525 = vmatprep.mubr.f32.mxu1 %v2111_v0  ;;  %v362_v3 = vld [vmem:[%s2380_s1] sm:$0xf]  ;;  %v533_v8 = vld [vmem:[#allocation2 + $0x8] sm:$0xff]  ;;  %vm371_vm1 = vcmask 31744   ;;  %v535_v10 = vld [vmem:[#allocation2 + $0x18] sm:$0xff]  ;;  %s353_s24 = sand.u32 1, %s2097_s10  }
  0x53   : > { %s357_s18 = scalar_select %p356_p10, %s2186_s13, 1  ;;  %1971 = vset.pattern.permute.xlu0 %v2112_v1  ;;  %1972 = vset.pattern.permute.xlu1 %v2112_v1  ;;  %v451_v4 = vld [vmem:[%s2381_s2] sm:$0xf]  ;;  %v537_v9 = vld [vmem:[#allocation2 + $0x28] sm:$0xff]  ;;  %v539_v11 = vld [vmem:[#allocation2 + $0x38] sm:$0xff] }
  0x54   : > { %v452_v6 = vld [vmem:[%s2383_s4] sm:$0xf]  ;;  %v1518_v12 = vpack.c.bf16 %v537_v9, %v533_v8  ;;  %v1582_v13 = vpack.c.bf16 %v539_v11, %v535_v10  ;;  %v534_v16 = vld [vmem:[#allocation2 + $0x10] sm:$0xff]  ;;  %v541_v19 = vld [vmem:[#allocation2 + $0x48] sm:$0xff]  ;;  %s1502_s26 = sshll.u32 %s353_s24, 3  ;;  %s1399_s22 = scalar_lea.sflag [#allocation4], %s353_s24 }
  0x55   : > { %s1516_s21 = sshll.u32 %s357_s18, 3  ;;  %v363_v7 = vld [vmem:[%s2382_s3] sm:$0xf]  ;;  %455 = vperm.xlu0 %1971, %v452_v6   ;;  %v538_v18 = vld [vmem:[#allocation2 + $0x30] sm:$0xff]  ;;  %v545_v20 = vld [vmem:[#allocation2 + $0x68] sm:$0xff]  ;;  %s355_s28 = scalar_lea.vmem [#allocation7], %s1502_s26 }
  0x56   : > { %s2290_s27 = scalar_lea.vmem %s2379_s0, %s1516_s21  ;;  %v532_v14 = vld [vmem:[#allocation2] sm:$0xff]  ;;  %v1584_v21 = vpack.c.bf16 %v538_v18, %v534_v16  ;;  %v1522_v22 = vpack.c.bf16 %v545_v20, %v541_v19  ;;  %v543_v23 = vld [vmem:[#allocation2 + $0x58] sm:$0xff]  ;;  %v542_v28 = vld [vmem:[#allocation2 + $0x50] sm:$0xff]  ;;  %s1413_s29 = sshll.u32 %s355_s28, 4  ;;  %s2337_s29 = int_to_ptr.vmem [resolvable:$true] %s1413_s29 }
  0x57   : > { %v361_v2 = vld [vmem:[%s2290_s27] sm:$0xff]  ;;  %v547_v24 = vld [vmem:[#allocation2 + $0x78] sm:$0xff]  ;;  %v546_v29 = vld [vmem:[#allocation2 + $0x70] sm:$0xff]  ;;  %s2035_s25 = scalar_lea.vmem %s2337_s29, 128  ;;  %p2407_p1 = scmp.ne.s32.totalorder %s2398_s19, 0 }
  0x58   : > { %v370_v5 = vcombine.high %v361_v2, %v361_v2  ;;  %v536_v15 = vld [vmem:[#allocation2 + $0x20] sm:$0xff]  ;;  %v1586_v26 = vpack.c.bf16 %v547_v24, %v543_v23  ;;  %v549_v31 = vld [vmem:[#allocation2 + $0x88] sm:$0xff]  ;;  %v551_v33 = vld [vmem:[#allocation2 + $0x98] sm:$0xff]  ;;  %v1588_v34 = vpack.c.bf16 %v546_v29, %v542_v28  ;;  %p2036_p12 = scmp.ne.s32.totalorder %s2337_s29, %s2035_s25 }
  0x59   : > { %v1520_v17 = vpack.c.bf16 %v536_v15, %v532_v14  ;;  %v540_v25 = vld [vmem:[#allocation2 + $0x40] sm:$0xff]  ;;  %366 = vperm.xlu0 %1971, %v363_v7   ;;  %v553_v32 = vld [vmem:[#allocation2 + $0xa8] sm:$0xff]  ;;  %v555_v36 = vld [vmem:[#allocation2 + $0xb8] sm:$0xff] }
  0x5a   : > { %1505 = vmatprep.subr.msk.mxu0 %vm375_vm0, %v370_v5  ;;  %1508 = vmatprep.subr.msk.mxu1 %vm375_vm0, %v370_v5  ;;  %v544_v27 = vld [vmem:[#allocation2 + $0x60] sm:$0xff]  ;;  %v1526_v35 = vpack.c.bf16 %v553_v32, %v549_v31  ;;  %v1590_v39 = vpack.c.bf16 %v555_v36, %v551_v33  ;;  %v550_v40 = vld [vmem:[#allocation2 + $0x90] sm:$0xff]  ;;  %v557_v42 = vld [vmem:[#allocation2 + $0xc8] sm:$0xff]  ;;  %p2037_p2 = pnand %p2036_p12, %p2407_p1 }
  0x5b   : > { %1506 = vmatpush1.msk.msra.mxu0 %vm375_vm0, %v361_v2  ;;  %1509 = vmatpush1.msk.msra.mxu1 %vm375_vm0, %v361_v2  ;;  %v1524_v30 = vpack.c.bf16 %v544_v27, %v540_v25  ;;  %v548_v37 = vld [vmem:[#allocation2 + $0x80] sm:$0xff]  ;;  %v554_v41 = vld [vmem:[#allocation2 + $0xb0] sm:$0xff]  ;;  %v561_v43 = vld [vmem:[#allocation2 + $0xe8] sm:$0xff] }
  0x5c   : > { %1507 = vmatmul.mubr.msk.f32.vlgmr.msra.gmra.mrb[0].mxu0 %vm371_vm1, %v362_v3  ;;  %1510 = vmatmul.mubr.msk.f32.vlgmr.msra.gmra.mrb[0].mxu1 %vm371_vm1, %v451_v4  ;;  %v552_v38 = vld [vmem:[#allocation2 + $0xa0] sm:$0xff]  ;;  %v559_v44 = vld [vmem:[#allocation2 + $0xd8] sm:$0xff]  ;;  %v1592_v47 = vpack.c.bf16 %v554_v41, %v550_v40  ;;  %v1530_v48 = vpack.c.bf16 %v561_v43, %v557_v42  ;;  %v558_v51 = vld [vmem:[#allocation2 + $0xd0] sm:$0xff]  ;;  %p2038_p3 = pneg %p2037_p2 }
  0x5d   : > { %1519 = vmatprep.subr.bf16.mxu0 %v1518_v12  ;;  %1583 = vmatprep.subr.bf16.mxu1 %v1582_v13  ;;  %v563_v45 = vld [vmem:[#allocation2 + $0xf8] sm:$0xff]  ;;  %v1528_v46 = vpack.c.bf16 %v552_v38, %v548_v37  ;;  %v556_v49 = vld [vmem:[#allocation2 + $0xc0] sm:$0xff]  ;;  %v562_v53 = vld [vmem:[#allocation2 + $0xf0] sm:$0xff] }
  0x5e   : > { %1521 = vmatpush1.bf16.msra.mxu0 %v1520_v17  ;;  %1585 = vmatpush1.bf16.msra.mxu1 %v1584_v21  ;;  %v560_v50 = vld [vmem:[#allocation2 + $0xe0] sm:$0xff]  ;;  %v1594_v52 = vpack.c.bf16 %v563_v45, %v559_v44  ;;  %v565_v54 = vld [vmem:[#allocation2 + $0x108] sm:$0xff]  ;;  %v567_v56 = vld [vmem:[#allocation2 + $0x118] sm:$0xff]  ;;  %v1596_v59 = vpack.c.bf16 %v562_v53, %v558_v51 }
  0x5f   : > { %1523 = vmatprep.subr.bf16.mxu0 %v1522_v22  ;;  %1587 = vmatprep.subr.bf16.mxu1 %v1586_v26  ;;  %v569_v55 = vld [vmem:[#allocation2 + $0x128] sm:$0xff]  ;;  %v571_v57 = vld [vmem:[#allocation2 + $0x138] sm:$0xff]  ;;  %v1532_v58 = vpack.c.bf16 %v560_v50, %v556_v49  ;;  %v564_v61 = vld [vmem:[#allocation2 + $0x100] sm:$0xff] }
  0x60   : > { %v1534_v60 = vpack.c.bf16 %v569_v55, %v565_v54  ;;  %v568_v62 = vld [vmem:[#allocation2 + $0x120] sm:$0xff]  ;;  %v566_v63 = vld [vmem:[#allocation2 + $0x110] sm:$0xff]  ;;  %v1598_v0 = vpack.c.bf16 %v571_v57, %v567_v56  ;;  %v573_v2 = vld [vmem:[#allocation2 + $0x148] sm:$0xff] }
  0x61   : > { %v570_v1 = vld [vmem:[#allocation2 + $0x130] sm:$0xff]  ;;  %v577_v3 = vld [vmem:[#allocation2 + $0x168] sm:$0xff]  ;;  %v575_v4 = vld [vmem:[#allocation2 + $0x158] sm:$0xff]  ;;  %v1536_v6 = vpack.c.bf16 %v568_v62, %v564_v61 }
  0x62   : > { %1525 = vmatpush1.bf16.msra.mxu0 %v1524_v30  ;;  %1589 = vmatpush1.bf16.msra.mxu1 %v1588_v34  ;;  %v579_v5 = vld [vmem:[#allocation2 + $0x178] sm:$0xff]  ;;  %v1600_v7 = vpack.c.bf16 %v570_v1, %v566_v63  ;;  %v1538_v8 = vpack.c.bf16 %v577_v3, %v573_v2  ;;  %v572_v9 = vld [vmem:[#allocation2 + $0x140] sm:$0xff]  ;;  %v574_v11 = vld [vmem:[#allocation2 + $0x150] sm:$0xff] }
  0x63   : > { %1527 = vmatprep.subr.bf16.mxu0 %v1526_v35  ;;  %1591 = vmatprep.subr.bf16.mxu1 %v1590_v39  ;;  %v576_v10 = vld [vmem:[#allocation2 + $0x160] sm:$0xff]  ;;  %v1602_v12 = vpack.c.bf16 %v579_v5, %v575_v4  ;;  %v578_v13 = vld [vmem:[#allocation2 + $0x170] sm:$0xff]  ;;  %v581_v14 = vld [vmem:[#allocation2 + $0x188] sm:$0xff] }
  0x64   : > { %v585_v15 = vld [vmem:[#allocation2 + $0x1a8] sm:$0xff]  ;;  %v583_v16 = vld [vmem:[#allocation2 + $0x198] sm:$0xff]  ;;  %v1540_v18 = vpack.c.bf16 %v576_v10, %v572_v9  ;;  %v1604_v19 = vpack.c.bf16 %v578_v13, %v574_v11  ;;  %v580_v21 = vld [vmem:[#allocation2 + $0x180] sm:$0xff] }
  0x65   : > { %v587_v17 = vld [vmem:[#allocation2 + $0x1b8] sm:$0xff]  ;;  %v1542_v20 = vpack.c.bf16 %v585_v15, %v581_v14  ;;  %v584_v22 = vld [vmem:[#allocation2 + $0x1a0] sm:$0xff]  ;;  %v582_v23 = vld [vmem:[#allocation2 + $0x190] sm:$0xff] }
  0x66   : > { %1529 = vmatpush1.bf16.msra.mxu0 %v1528_v46  ;;  %1593 = vmatpush1.bf16.msra.mxu1 %v1592_v47  ;;  %v1606_v24 = vpack.c.bf16 %v587_v17, %v583_v16  ;;  %v586_v25 = vld [vmem:[#allocation2 + $0x1b0] sm:$0xff]  ;;  %v589_v26 = vld [vmem:[#allocation2 + $0x1c8] sm:$0xff]  ;;  %v591_v28 = vld [vmem:[#allocation2 + $0x1d8] sm:$0xff]  ;;  %v1544_v30 = vpack.c.bf16 %v584_v22, %v580_v21 }
  0x67   : > { %1531 = vmatprep.subr.bf16.mxu0 %v1530_v48  ;;  %1595 = vmatprep.subr.bf16.mxu1 %v1594_v52  ;;  %v593_v27 = vld [vmem:[#allocation2 + $0x1e8] sm:$0xff]  ;;  %v595_v29 = vld [vmem:[#allocation2 + $0x1f8] sm:$0xff]  ;;  %v1608_v31 = vpack.c.bf16 %v586_v25, %v582_v23  ;;  %v588_v33 = vld [vmem:[#allocation2 + $0x1c0] sm:$0xff] }
  0x68   : > { %v1546_v32 = vpack.c.bf16 %v593_v27, %v589_v26  ;;  %v592_v34 = vld [vmem:[#allocation2 + $0x1e0] sm:$0xff]  ;;  %v590_v35 = vld [vmem:[#allocation2 + $0x1d0] sm:$0xff]  ;;  %v1610_v36 = vpack.c.bf16 %v595_v29, %v591_v28  ;;  %v597_v38 = vld [vmem:[#allocation2 + $0x208] sm:$0xff] }
  0x69   : > { %v594_v37 = vld [vmem:[#allocation2 + $0x1f0] sm:$0xff]  ;;  %v601_v39 = vld [vmem:[#allocation2 + $0x228] sm:$0xff]  ;;  %v599_v40 = vld [vmem:[#allocation2 + $0x218] sm:$0xff]  ;;  %v1548_v42 = vpack.c.bf16 %v592_v34, %v588_v33 }
  0x6a   : > { %1533 = vmatpush1.bf16.msra.mxu0 %v1532_v58  ;;  %1597 = vmatpush1.bf16.msra.mxu1 %v1596_v59  ;;  %v603_v41 = vld [vmem:[#allocation2 + $0x238] sm:$0xff]  ;;  %v1612_v43 = vpack.c.bf16 %v594_v37, %v590_v35  ;;  %v1550_v44 = vpack.c.bf16 %v601_v39, %v597_v38  ;;  %v596_v45 = vld [vmem:[#allocation2 + $0x200] sm:$0xff]  ;;  %v598_v47 = vld [vmem:[#allocation2 + $0x210] sm:$0xff] }
  0x6b   : > { %1535 = vmatprep.subr.bf16.mxu0 %v1534_v60  ;;  %1599 = vmatprep.subr.bf16.mxu1 %v1598_v0  ;;  %v600_v46 = vld [vmem:[#allocation2 + $0x220] sm:$0xff]  ;;  %v1614_v48 = vpack.c.bf16 %v603_v41, %v599_v40  ;;  %v602_v49 = vld [vmem:[#allocation2 + $0x230] sm:$0xff]  ;;  %v605_v50 = vld [vmem:[#allocation2 + $0x248] sm:$0xff] }
  0x6c   : > { %v609_v51 = vld [vmem:[#allocation2 + $0x268] sm:$0xff]  ;;  %v607_v52 = vld [vmem:[#allocation2 + $0x258] sm:$0xff]  ;;  %v1552_v54 = vpack.c.bf16 %v600_v46, %v596_v45  ;;  %v1616_v55 = vpack.c.bf16 %v602_v49, %v598_v47  ;;  %v604_v57 = vld [vmem:[#allocation2 + $0x240] sm:$0xff] }
  0x6d   : > { %v611_v53 = vld [vmem:[#allocation2 + $0x278] sm:$0xff]  ;;  %v1554_v56 = vpack.c.bf16 %v609_v51, %v605_v50  ;;  %v608_v58 = vld [vmem:[#allocation2 + $0x260] sm:$0xff]  ;;  %v606_v59 = vld [vmem:[#allocation2 + $0x250] sm:$0xff] }
  0x6e   : > { %1537 = vmatpush1.bf16.msra.mxu0 %v1536_v6  ;;  %1601 = vmatpush1.bf16.msra.mxu1 %v1600_v7  ;;  %v1618_v60 = vpack.c.bf16 %v611_v53, %v607_v52  ;;  %v610_v61 = vld [vmem:[#allocation2 + $0x270] sm:$0xff]  ;;  %v613_v62 = vld [vmem:[#allocation2 + $0x288] sm:$0xff]  ;;  %v615_v0 = vld [vmem:[#allocation2 + $0x298] sm:$0xff]  ;;  %v1556_v2 = vpack.c.bf16 %v608_v58, %v604_v57 }
  0x6f   : > { %1539 = vmatprep.subr.bf16.mxu0 %v1538_v8  ;;  %1603 = vmatprep.subr.bf16.mxu1 %v1602_v12  ;;  %v617_v63 = vld [vmem:[#allocation2 + $0x2a8] sm:$0xff]  ;;  %v619_v1 = vld [vmem:[#allocation2 + $0x2b8] sm:$0xff]  ;;  %v1620_v3 = vpack.c.bf16 %v610_v61, %v606_v59  ;;  %v612_v5 = vld [vmem:[#allocation2 + $0x280] sm:$0xff] }
  0x70   : > { %v1558_v4 = vpack.c.bf16 %v617_v63, %v613_v62  ;;  %v616_v6 = vld [vmem:[#allocation2 + $0x2a0] sm:$0xff]  ;;  %v614_v7 = vld [vmem:[#allocation2 + $0x290] sm:$0xff]  ;;  %v1622_v8 = vpack.c.bf16 %v619_v1, %v615_v0  ;;  %v621_v10 = vld [vmem:[#allocation2 + $0x2c8] sm:$0xff] }
  0x71   : > { %v618_v9 = vld [vmem:[#allocation2 + $0x2b0] sm:$0xff]  ;;  %v625_v11 = vld [vmem:[#allocation2 + $0x2e8] sm:$0xff]  ;;  %v623_v12 = vld [vmem:[#allocation2 + $0x2d8] sm:$0xff]  ;;  %v1560_v14 = vpack.c.bf16 %v616_v6, %v612_v5 }
  0x72   : > { %1541 = vmatpush1.bf16.msra.mxu0 %v1540_v18  ;;  %1605 = vmatpush1.bf16.msra.mxu1 %v1604_v19  ;;  %v627_v13 = vld [vmem:[#allocation2 + $0x2f8] sm:$0xff]  ;;  %v1624_v15 = vpack.c.bf16 %v618_v9, %v614_v7  ;;  %v1562_v16 = vpack.c.bf16 %v625_v11, %v621_v10  ;;  %v620_v17 = vld [vmem:[#allocation2 + $0x2c0] sm:$0xff]  ;;  %v622_v19 = vld [vmem:[#allocation2 + $0x2d0] sm:$0xff] }
  0x73   : > { %1543 = vmatprep.subr.bf16.mxu0 %v1542_v20  ;;  %1607 = vmatprep.subr.bf16.mxu1 %v1606_v24  ;;  %v624_v18 = vld [vmem:[#allocation2 + $0x2e0] sm:$0xff]  ;;  %v1626_v20 = vpack.c.bf16 %v627_v13, %v623_v12  ;;  %v626_v21 = vld [vmem:[#allocation2 + $0x2f0] sm:$0xff]  ;;  %v629_v22 = vld [vmem:[#allocation2 + $0x308] sm:$0xff] }
  0x74   : > { %v633_v23 = vld [vmem:[#allocation2 + $0x328] sm:$0xff]  ;;  %v631_v24 = vld [vmem:[#allocation2 + $0x318] sm:$0xff]  ;;  %v1564_v26 = vpack.c.bf16 %v624_v18, %v620_v17  ;;  %v1628_v27 = vpack.c.bf16 %v626_v21, %v622_v19  ;;  %v628_v29 = vld [vmem:[#allocation2 + $0x300] sm:$0xff] }
  0x75   : > { %v635_v25 = vld [vmem:[#allocation2 + $0x338] sm:$0xff]  ;;  %v1566_v28 = vpack.c.bf16 %v633_v23, %v629_v22  ;;  %v634_v33 = vld [vmem:[#allocation2 + $0x330] sm:$0xff]  ;;  %v637_v34 = vld [vmem:[#allocation2 + $0x348] sm:$0xff] }
  0x76   : > { %1545 = vmatpush1.bf16.msra.mxu0 %v1544_v30  ;;  %1609 = vmatpush1.bf16.msra.mxu1 %v1608_v31  ;;  %v632_v30 = vld [vmem:[#allocation2 + $0x320] sm:$0xff]  ;;  %v630_v31 = vld [vmem:[#allocation2 + $0x310] sm:$0xff]  ;;  %v641_v35 = vld [vmem:[#allocation2 + $0x368] sm:$0xff] }
  0x77   : > { %1547 = vmatprep.subr.bf16.mxu0 %v1546_v32  ;;  %1611 = vmatprep.subr.bf16.mxu1 %v1610_v36  ;;  %v1630_v32 = vpack.c.bf16 %v635_v25, %v631_v24  ;;  %v639_v36 = vld [vmem:[#allocation2 + $0x358] sm:$0xff]  ;;  %v1568_v38 = vpack.c.bf16 %v632_v30, %v628_v29  ;;  %v1632_v39 = vpack.c.bf16 %v634_v33, %v630_v31  ;;  %v636_v41 = vld [vmem:[#allocation2 + $0x340] sm:$0xff]  ;;  %v642_v45 = vld [vmem:[#allocation2 + $0x370] sm:$0xff] }
  0x78   : > { %v643_v37 = vld [vmem:[#allocation2 + $0x378] sm:$0xff]  ;;  %v1570_v40 = vpack.c.bf16 %v641_v35, %v637_v34  ;;  %v645_v46 = vld [vmem:[#allocation2 + $0x388] sm:$0xff]  ;;  %v644_v53 = vld [vmem:[#allocation2 + $0x380] sm:$0xff] }
  0x79   : > { %v649_v47 = vld [vmem:[#allocation2 + $0x3a8] sm:$0xff]  ;;  %v651_v49 = vld [vmem:[#allocation2 + $0x3b8] sm:$0xff]  ;;  %v650_v57 = vld [vmem:[#allocation2 + $0x3b0] sm:$0xff] }
  0x7a   : > { %1549 = vmatpush1.bf16.msra.mxu0 %v1548_v42  ;;  %1613 = vmatpush1.bf16.msra.mxu1 %v1612_v43  ;;  %v640_v42 = vld [vmem:[#allocation2 + $0x360] sm:$0xff]  ;;  %v638_v43 = vld [vmem:[#allocation2 + $0x350] sm:$0xff]  ;;  %v1574_v52 = vpack.c.bf16 %v649_v47, %v645_v46  ;;  %v657_v61 = vld [vmem:[#allocation2 + $0x3e8] sm:$0xff] }
  0x7b   : > { %1551 = vmatprep.subr.bf16.mxu0 %v1550_v44  ;;  %1615 = vmatprep.subr.bf16.mxu1 %v1614_v48  ;;  %v1634_v44 = vpack.c.bf16 %v643_v37, %v639_v36  ;;  %v647_v48 = vld [vmem:[#allocation2 + $0x398] sm:$0xff]  ;;  %v1572_v50 = vpack.c.bf16 %v640_v42, %v636_v41  ;;  %v1636_v51 = vpack.c.bf16 %v642_v45, %v638_v43  ;;  %v652_v1 = vld [vmem:[#allocation2 + $0x3c0] sm:$0xff]  ;;  %v654_v5 = vld [vmem:[#allocation2 + $0x3d0] sm:$0xff] }
  0x7c   : > { %v655_v62 = vld [vmem:[#allocation2 + $0x3d8] sm:$0xff]  ;;  %v658_v6 = vld [vmem:[#allocation2 + $0x3f0] sm:$0xff]  ;;  %v811_v9 = vld [vmem:[#allocation5 + $0x28] sm:$0xff] }
  0x7d   : > { %v659_v0 = vld [vmem:[#allocation2 + $0x3f8] sm:$0xff]  ;;  %v1644_v7 = vpack.c.bf16 %v658_v6, %v654_v5  ;;  %v808_v17 = vld [vmem:[#allocation5 + $0x10] sm:$0xff]  ;;  %v815_v19 = vld [vmem:[#allocation5 + $0x48] sm:$0xff] }
  0x7e   : > { %1553 = vmatpush1.bf16.msra.mxu0 %v1552_v54  ;;  %1617 = vmatpush1.bf16.msra.mxu1 %v1616_v55  ;;  %v648_v54 = vld [vmem:[#allocation2 + $0x3a0] sm:$0xff]  ;;  %v1638_v55 = vpack.c.bf16 %v651_v49, %v647_v48  ;;  %v809_v10 = vld [vmem:[#allocation5 + $0x18] sm:$0xff]  ;;  %v812_v18 = vld [vmem:[#allocation5 + $0x30] sm:$0xff] }
  0x7f   : > { %1555 = vmatprep.subr.bf16.mxu0 %v1554_v56  ;;  %1619 = vmatprep.subr.bf16.mxu1 %v1618_v60  ;;  %v646_v56 = vld [vmem:[#allocation2 + $0x390] sm:$0xff]  ;;  %v1576_v58 = vpack.c.bf16 %v648_v54, %v644_v53  ;;  %v653_v60 = vld [vmem:[#allocation2 + $0x3c8] sm:$0xff]  ;;  %v813_v12 = vld [vmem:[#allocation5 + $0x38] sm:$0xff]  ;;  %v1776_v29 = vpack.c.bf16 %v812_v18, %v808_v17 }
  0x80   : > { %v1640_v59 = vpack.c.bf16 %v650_v57, %v646_v56  ;;  %v1578_v63 = vpack.c.bf16 %v657_v61, %v653_v60  ;;  %v1774_v13 = vpack.c.bf16 %v813_v12, %v809_v10  ;;  %v819_v22 = vld [vmem:[#allocation5 + $0x68] sm:$0xff]  ;;  %v817_v23 = vld [vmem:[#allocation5 + $0x58] sm:$0xff]  ;;  %v814_v30 = vld [vmem:[#allocation5 + $0x40] sm:$0xff] }
  0x81   : > { %v821_v24 = vld [vmem:[#allocation5 + $0x78] sm:$0xff]  ;;  %v818_v31 = vld [vmem:[#allocation5 + $0x60] sm:$0xff]  ;;  %v1650_v33 = vpack.c.bf16 %v819_v22, %v815_v19  ;;  %v816_v35 = vld [vmem:[#allocation5 + $0x50] sm:$0xff] }
  0x82   : > { %1557 = vmatpush1.bf16.msra.mxu0 %v1556_v2  ;;  %1621 = vmatpush1.bf16.msra.mxu1 %v1620_v3  ;;  %v656_v2 = vld [vmem:[#allocation2 + $0x3e0] sm:$0xff]  ;;  %v1642_v3 = vpack.c.bf16 %v659_v0, %v655_v62  ;;  %v1778_v34 = vpack.c.bf16 %v821_v24, %v817_v23  ;;  %v820_v36 = vld [vmem:[#allocation5 + $0x70] sm:$0xff]  ;;  %v823_v37 = vld [vmem:[#allocation5 + $0x88] sm:$0xff]  ;;  %v1652_v41 = vpack.c.bf16 %v818_v31, %v814_v30 }
  0x83   : > { %1559 = vmatprep.subr.bf16.mxu0 %v1558_v4  ;;  %1623 = vmatprep.subr.bf16.mxu1 %v1622_v8  ;;  %v1580_v4 = vpack.c.bf16 %v656_v2, %v652_v1  ;;  %v807_v8 = vld [vmem:[#allocation5 + $0x8] sm:$0xff]  ;;  %v1780_v42 = vpack.c.bf16 %v820_v36, %v816_v35  ;;  %v822_v43 = vld [vmem:[#allocation5 + $0x80] sm:$0xff]  ;;  %v824_v47 = vld [vmem:[#allocation5 + $0x90] sm:$0xff] }
  0x84   : > { %v1646_v11 = vpack.c.bf16 %v811_v9, %v807_v8  ;;  %v828_v48 = vld [vmem:[#allocation5 + $0xb0] sm:$0xff]  ;;  %v831_v49 = vld [vmem:[#allocation5 + $0xc8] sm:$0xff]  ;;  %v834_v56 = vld [vmem:[#allocation5 + $0xe0] sm:$0xff] }
  0x85   : > { %v1784_v54 = vpack.c.bf16 %v828_v48, %v824_v47  ;;  %v836_v60 = vld [vmem:[#allocation5 + $0xf0] sm:$0xff]  ;;  %v839_v61 = vld [vmem:[#allocation5 + $0x108] sm:$0xff]  ;;  %v845_v0 = vld [vmem:[#allocation5 + $0x138] sm:$0xff] }
  0x86   : > { %1561 = vmatpush1.bf16.msra.mxu0 %v1560_v14  ;;  %1625 = vmatpush1.bf16.msra.mxu1 %v1624_v15  ;;  %v806_v14 = vld [vmem:[#allocation5] sm:$0xff]  ;;  %v843_v62 = vld [vmem:[#allocation5 + $0x128] sm:$0xff]  ;;  %v844_v8 = vld [vmem:[#allocation5 + $0x130] sm:$0xff] }
  0x87   : > { %1563 = vmatprep.subr.bf16.mxu0 %v1562_v16  ;;  %1627 = vmatprep.subr.bf16.mxu1 %v1626_v20  ;;  %v810_v15 = vld [vmem:[#allocation5 + $0x20] sm:$0xff]  ;;  %v1662_v5 = vpack.c.bf16 %v843_v62, %v839_v61  ;;  %v847_v9 = vld [vmem:[#allocation5 + $0x148] sm:$0xff]  ;;  %v853_v12 = vld [vmem:[#allocation5 + $0x178] sm:$0xff] }
  0x88   : > { %v851_v10 = vld [vmem:[#allocation5 + $0x168] sm:$0xff]  ;;  %v848_v19 = vld [vmem:[#allocation5 + $0x150] sm:$0xff]  ;;  %v857_v24 = vld [vmem:[#allocation5 + $0x198] sm:$0xff] }
  0x89   : > { %v1666_v17 = vpack.c.bf16 %v851_v10, %v847_v9  ;;  %v855_v22 = vld [vmem:[#allocation5 + $0x188] sm:$0xff]  ;;  %v858_v30 = vld [vmem:[#allocation5 + $0x1a0] sm:$0xff]  ;;  %v881_v61 = vld [vmem:[#allocation5 + $0x258] sm:$0xff] }
  0x8a   : > { %1565 = vmatpush1.bf16.msra.mxu0 %v1564_v26  ;;  %1629 = vmatpush1.bf16.msra.mxu1 %v1628_v27  ;;  %v859_v23 = vld [vmem:[#allocation5 + $0x1a8] sm:$0xff]  ;;  %v885_v62 = vld [vmem:[#allocation5 + $0x278] sm:$0xff] }
  0x8b   : > { %1567 = vmatprep.subr.bf16.mxu0 %v1566_v28  ;;  %1631 = vmatprep.subr.bf16.mxu1 %v1630_v32  ;;  %v1648_v28 = vpack.c.bf16 %v810_v15, %v806_v14  ;;  %v846_v15 = vld [vmem:[#allocation5 + $0x140] sm:$0xff]  ;;  %v1670_v31 = vpack.c.bf16 %v859_v23, %v855_v22  ;;  %v863_v35 = vld [vmem:[#allocation5 + $0x1c8] sm:$0xff]  ;;  %v889_v9 = vld [vmem:[#allocation5 + $0x298] sm:$0xff] }
  0x8c   : > { %v867_v36 = vld [vmem:[#allocation5 + $0x1e8] sm:$0xff]  ;;  %v893_v10 = vld [vmem:[#allocation5 + $0x2b8] sm:$0xff] }
  0x8d   : > { %v871_v47 = vld [vmem:[#allocation5 + $0x208] sm:$0xff]  ;;  %v897_v22 = vld [vmem:[#allocation5 + $0x2d8] sm:$0xff] }
  0x8e   : > { %1569 = vmatpush1.bf16.msra.mxu0 %v1568_v38  ;;  %1633 = vmatpush1.bf16.msra.mxu1 %v1632_v39  ;;  %v827_v38 = vld [vmem:[#allocation5 + $0xa8] sm:$0xff]  ;;  %v825_v39 = vld [vmem:[#allocation5 + $0x98] sm:$0xff] }
  0x8f   : > { %1571 = vmatprep.subr.bf16.mxu0 %v1570_v40  ;;  %1635 = vmatprep.subr.bf16.mxu1 %v1634_v44  ;;  %v829_v40 = vld [vmem:[#allocation5 + $0xb8] sm:$0xff]  ;;  %v826_v44 = vld [vmem:[#allocation5 + $0xa0] sm:$0xff]  ;;  %v1654_v45 = vpack.c.bf16 %v827_v38, %v823_v37  ;;  %v875_v48 = vld [vmem:[#allocation5 + $0x228] sm:$0xff] }
  0x90   : > { %v1782_v46 = vpack.c.bf16 %v829_v40, %v825_v39  ;;  %v1656_v53 = vpack.c.bf16 %v826_v44, %v822_v43  ;;  %v865_v37 = vld [vmem:[#allocation5 + $0x1d8] sm:$0xff]  ;;  %v1674_v43 = vpack.c.bf16 %v867_v36, %v863_v35 }
  0x91   : > { %v869_v38 = vld [vmem:[#allocation5 + $0x1f8] sm:$0xff] }
  0x92   : > { %1573 = vmatpush1.bf16.msra.mxu0 %v1572_v50  ;;  %1637 = vmatpush1.bf16.msra.mxu1 %v1636_v51  ;;  %v835_v50 = vld [vmem:[#allocation5 + $0xe8] sm:$0xff]  ;;  %v833_v51 = vld [vmem:[#allocation5 + $0xd8] sm:$0xff]  ;;  %v1802_v44 = vpack.c.bf16 %v869_v38, %v865_v37 }
  0x93   : > { %1575 = vmatprep.subr.bf16.mxu0 %v1574_v52  ;;  %1639 = vmatprep.subr.bf16.mxu1 %v1638_v55  ;;  %v837_v52 = vld [vmem:[#allocation5 + $0xf8] sm:$0xff]  ;;  %v830_v55 = vld [vmem:[#allocation5 + $0xc0] sm:$0xff]  ;;  %v1658_v57 = vpack.c.bf16 %v835_v50, %v831_v49 }
  0x94   : > { %v1660_v1 = vpack.c.bf16 %v834_v56, %v830_v55  ;;  %v873_v49 = vld [vmem:[#allocation5 + $0x218] sm:$0xff]  ;;  %v1678_v55 = vpack.c.bf16 %v875_v48, %v871_v47 }
  0x95   : > { %v877_v50 = vld [vmem:[#allocation5 + $0x238] sm:$0xff] }
  0x96   : > { %1577 = vmatpush1.bf16.msra.mxu0 %v1576_v58  ;;  %1641 = vmatpush1.bf16.msra.mxu1 %v1640_v59  ;;  %v1786_v58 = vpack.c.bf16 %v837_v52, %v833_v51  ;;  %v832_v59 = vld [vmem:[#allocation5 + $0xd0] sm:$0xff]  ;;  %v1806_v56 = vpack.c.bf16 %v877_v50, %v873_v49  ;;  %v901_v23 = vld [vmem:[#allocation5 + $0x2f8] sm:$0xff] }
  0x97   : > { %1579 = vmatprep.subr.bf16.mxu0 %v1578_v63  ;;  %1643 = vmatprep.subr.bf16.mxu1 %v1642_v3  ;;  %v841_v63 = vld [vmem:[#allocation5 + $0x118] sm:$0xff]  ;;  %v1788_v2 = vpack.c.bf16 %v836_v60, %v832_v59  ;;  %v838_v3 = vld [vmem:[#allocation5 + $0x100] sm:$0xff]  ;;  %v879_v59 = vld [vmem:[#allocation5 + $0x248] sm:$0xff] }
  0x98   : > { %v1790_v6 = vpack.c.bf16 %v845_v0, %v841_v63  ;;  %v883_v60 = vld [vmem:[#allocation5 + $0x268] sm:$0xff]  ;;  %v905_v35 = vld [vmem:[#allocation5 + $0x318] sm:$0xff] }
  0x99   : > { %v909_v36 = vld [vmem:[#allocation5 + $0x338] sm:$0xff] }
  0x9a   : > { %1581 = vmatpush1.bf16.msra.mxu0 %v1580_v4  ;;  %1645 = vmatpush1.bf16.msra.mxu1 %v1644_v7  ;;  %v842_v4 = vld [vmem:[#allocation5 + $0x120] sm:$0xff]  ;;  %v840_v7 = vld [vmem:[#allocation5 + $0x110] sm:$0xff]  ;;  %v913_v47 = vld [vmem:[#allocation5 + $0x358] sm:$0xff] }
  0x9b   : > { %1647 = vmatprep.subr.bf16.mxu0 %v1646_v11  ;;  %1775 = vmatprep.subr.bf16.mxu1 %v1774_v13  ;;  %v849_v11 = vld [vmem:[#allocation5 + $0x158] sm:$0xff]  ;;  %v1664_v13 = vpack.c.bf16 %v842_v4, %v838_v3  ;;  %v1792_v14 = vpack.c.bf16 %v844_v8, %v840_v7  ;;  %v1682_v3 = vpack.c.bf16 %v883_v60, %v879_v59  ;;  %v887_v7 = vld [vmem:[#allocation5 + $0x288] sm:$0xff] }
  0x9c   : > { %v1794_v18 = vpack.c.bf16 %v853_v12, %v849_v11  ;;  %v1810_v4 = vpack.c.bf16 %v885_v62, %v881_v61  ;;  %v891_v8 = vld [vmem:[#allocation5 + $0x2a8] sm:$0xff]  ;;  %v917_v48 = vld [vmem:[#allocation5 + $0x378] sm:$0xff] }
  0x9d   : > { %v921_v59 = vld [vmem:[#allocation5 + $0x398] sm:$0xff] }
  0x9e   : > { %v925_v60 = vld [vmem:[#allocation5 + $0x3b8] sm:$0xff] }
  0xd4   : > { %v456_v16 = vpop.permute.xlu0 %455 }
 0x12f   : > { %v2311_v20 = vpop.f32.mrb[0].mxu0  ;;  %v527_v21 = vpop.f32.mrb[0].mxu1 }
 0x130   : > { %v2313_v25 = vpop.f32.mrb[1].mxu0  ;;  %v529_v26 = vpop.f32.mrb[1].mxu1  ;;  %v528_v32 = vadd.f32 %v527_v21, %v456_v16  ;;  %v852_v21 = vld [vmem:[#allocation5 + $0x170] sm:$0xff] }
 0x131   : > { %v530_v27 = vadd.f32 %v529_v26, %v456_v16  ;;  %v850_v16 = vld [vmem:[#allocation5 + $0x160] sm:$0xff]  ;;  %v861_v26 = vld [vmem:[#allocation5 + $0x1b8] sm:$0xff] }
 0x133   : > { %724 = vmatprep.mubr.f32.mxu0 %v530_v27  ;;  %795 = vmatprep.mubr.f32.mxu1 %v530_v27  ;;  %v1668_v27 = vpack.c.bf16 %v850_v16, %v846_v15  ;;  %v1686_v15 = vpack.c.bf16 %v891_v8, %v887_v7  ;;  %v1814_v16 = vpack.c.bf16 %v893_v10, %v889_v9  ;;  %v927_v7 = vld [vmem:[#allocation5 + $0x3c8] sm:$0xff]  ;;  %v929_v9 = vld [vmem:[#allocation5 + $0x3d8] sm:$0xff] }
 0x134   : > { %725 = vmatmul.mubr.f32.vlgmr.msra.gmra.mrb[2].mxu0 %v528_v32  ;;  %796 = vmatmul.mubr.f32.vlgmr.msra.gmra.mrb[2].mxu1 %v528_v32  ;;  %v1798_v32 = vpack.c.bf16 %v861_v26, %v857_v24  ;;  %v931_v8 = vld [vmem:[#allocation5 + $0x3e8] sm:$0xff] }
 0x135   : > { %1649 = vmatpush1.bf16.msra.mxu0 %v1648_v28  ;;  %1777 = vmatpush1.bf16.msra.mxu1 %v1776_v29  ;;  %v1796_v28 = vpack.c.bf16 %v852_v21, %v848_v19  ;;  %v854_v29 = vld [vmem:[#allocation5 + $0x180] sm:$0xff]  ;;  %v895_v19 = vld [vmem:[#allocation5 + $0x2c8] sm:$0xff]  ;;  %v1706_v10 = vpack.c.bf16 %v931_v8, %v927_v7 }
 0x136   : > { %1651 = vmatprep.subr.bf16.mxu0 %v1650_v33  ;;  %1779 = vmatprep.subr.bf16.mxu1 %v1778_v34  ;;  %v856_v33 = vld [vmem:[#allocation5 + $0x190] sm:$0xff]  ;;  %v1672_v39 = vpack.c.bf16 %v858_v30, %v854_v29  ;;  %v899_v21 = vld [vmem:[#allocation5 + $0x2e8] sm:$0xff]  ;;  %v1818_v30 = vpack.c.bf16 %v901_v23, %v897_v22  ;;  %v937_v22 = vld [vmem:[#allocation5 + $0x418] sm:$0xff] }
 0x137   : > { %v860_v34 = vld [vmem:[#allocation5 + $0x1b0] sm:$0xff]  ;;  %v1690_v29 = vpack.c.bf16 %v899_v21, %v895_v19  ;;  %v935_v19 = vld [vmem:[#allocation5 + $0x408] sm:$0xff]  ;;  %v958_v8 = vld [vmem:[#allocation5 + $0x4c0] sm:$0xff] }
 0x138   : > { %v1800_v40 = vpack.c.bf16 %v860_v34, %v856_v33  ;;  %v903_v33 = vld [vmem:[#allocation5 + $0x308] sm:$0xff] }
 0x139   : > { %1653 = vmatpush1.bf16.msra.mxu0 %v1652_v41  ;;  %1781 = vmatpush1.bf16.msra.mxu1 %v1780_v42  ;;  %v862_v41 = vld [vmem:[#allocation5 + $0x1c0] sm:$0xff]  ;;  %v907_v34 = vld [vmem:[#allocation5 + $0x328] sm:$0xff] }
 0x13a   : > { %1655 = vmatprep.subr.bf16.mxu0 %v1654_v45  ;;  %1783 = vmatprep.subr.bf16.mxu1 %v1782_v46  ;;  %v866_v42 = vld [vmem:[#allocation5 + $0x1e0] sm:$0xff]  ;;  %v864_v45 = vld [vmem:[#allocation5 + $0x1d0] sm:$0xff]  ;;  %v939_v21 = vld [vmem:[#allocation5 + $0x428] sm:$0xff] }
 0x13b   : > { %v868_v46 = vld [vmem:[#allocation5 + $0x1f0] sm:$0xff]  ;;  %v1676_v51 = vpack.c.bf16 %v866_v42, %v862_v41  ;;  %v1694_v41 = vpack.c.bf16 %v907_v34, %v903_v33  ;;  %v1822_v42 = vpack.c.bf16 %v909_v36, %v905_v35  ;;  %v1710_v23 = vpack.c.bf16 %v939_v21, %v935_v19  ;;  %v966_v21 = vld [vmem:[#allocation5 + $0x500] sm:$0xff] }
 0x13c   : > { %v1804_v52 = vpack.c.bf16 %v868_v46, %v864_v45  ;;  %v911_v45 = vld [vmem:[#allocation5 + $0x348] sm:$0xff]  ;;  %v936_v33 = vld [vmem:[#allocation5 + $0x410] sm:$0xff] }
 0x13d   : > { %1657 = vmatpush1.bf16.msra.mxu0 %v1656_v53  ;;  %1785 = vmatpush1.bf16.msra.mxu1 %v1784_v54  ;;  %v870_v53 = vld [vmem:[#allocation5 + $0x200] sm:$0xff]  ;;  %v915_v46 = vld [vmem:[#allocation5 + $0x368] sm:$0xff]  ;;  %v940_v34 = vld [vmem:[#allocation5 + $0x430] sm:$0xff] }
 0x13e   : > { %1659 = vmatprep.subr.bf16.mxu0 %v1658_v57  ;;  %1787 = vmatprep.subr.bf16.mxu1 %v1786_v58  ;;  %v874_v54 = vld [vmem:[#allocation5 + $0x220] sm:$0xff]  ;;  %v872_v57 = vld [vmem:[#allocation5 + $0x210] sm:$0xff] }
 0x13f   : > { %v876_v58 = vld [vmem:[#allocation5 + $0x230] sm:$0xff]  ;;  %v1680_v63 = vpack.c.bf16 %v874_v54, %v870_v53  ;;  %v1698_v53 = vpack.c.bf16 %v915_v46, %v911_v45  ;;  %v1826_v54 = vpack.c.bf16 %v917_v48, %v913_v47  ;;  %v949_v45 = vld [vmem:[#allocation5 + $0x478] sm:$0xff] }
 0x140   : > { %v1808_v0 = vpack.c.bf16 %v876_v58, %v872_v57  ;;  %v919_v57 = vld [vmem:[#allocation5 + $0x388] sm:$0xff] }
 0x141   : > { %1661 = vmatpush1.bf16.msra.mxu0 %v1660_v1  ;;  %1789 = vmatpush1.bf16.msra.mxu1 %v1788_v2  ;;  %v878_v1 = vld [vmem:[#allocation5 + $0x240] sm:$0xff]  ;;  %v923_v58 = vld [vmem:[#allocation5 + $0x3a8] sm:$0xff] }
 0x142   : > { %1663 = vmatprep.subr.bf16.mxu0 %v1662_v5  ;;  %1791 = vmatprep.subr.bf16.mxu1 %v1790_v6  ;;  %v882_v2 = vld [vmem:[#allocation5 + $0x260] sm:$0xff]  ;;  %v880_v5 = vld [vmem:[#allocation5 + $0x250] sm:$0xff] }
 0x143   : > { %v884_v6 = vld [vmem:[#allocation5 + $0x270] sm:$0xff]  ;;  %v1684_v11 = vpack.c.bf16 %v882_v2, %v878_v1  ;;  %v1830_v1 = vpack.c.bf16 %v925_v60, %v921_v59  ;;  %v922_v2 = vld [vmem:[#allocation5 + $0x3a0] sm:$0xff] }
 0x144   : > { %v1812_v12 = vpack.c.bf16 %v884_v6, %v880_v5  ;;  %v950_v60 = vld [vmem:[#allocation5 + $0x480] sm:$0xff] }
 0x145   : > { %1665 = vmatpush1.bf16.msra.mxu0 %v1664_v13  ;;  %1793 = vmatpush1.bf16.msra.mxu1 %v1792_v14  ;;  %v886_v13 = vld [vmem:[#allocation5 + $0x280] sm:$0xff] }
 0x146   : > { %1667 = vmatprep.subr.bf16.mxu0 %v1666_v17  ;;  %1795 = vmatprep.subr.bf16.mxu1 %v1794_v18  ;;  %v890_v14 = vld [vmem:[#allocation5 + $0x2a0] sm:$0xff]  ;;  %v888_v17 = vld [vmem:[#allocation5 + $0x290] sm:$0xff] }
 0x147   : > { %v892_v18 = vld [vmem:[#allocation5 + $0x2b0] sm:$0xff]  ;;  %v1688_v24 = vpack.c.bf16 %v890_v14, %v886_v13  ;;  %v930_v13 = vld [vmem:[#allocation5 + $0x3e0] sm:$0xff] }
 0x148   : > { %v1816_v26 = vpack.c.bf16 %v892_v18, %v888_v17  ;;  %v932_v17 = vld [vmem:[#allocation5 + $0x3f0] sm:$0xff] }
 0x149   : > { %1669 = vmatpush1.bf16.msra.mxu0 %v1668_v27  ;;  %1797 = vmatpush1.bf16.msra.mxu1 %v1796_v28  ;;  %v894_v27 = vld [vmem:[#allocation5 + $0x2c0] sm:$0xff] }
 0x14a   : > { %1671 = vmatprep.subr.bf16.mxu0 %v1670_v31  ;;  %1799 = vmatprep.subr.bf16.mxu1 %v1798_v32  ;;  %v898_v28 = vld [vmem:[#allocation5 + $0x2e0] sm:$0xff]  ;;  %v896_v31 = vld [vmem:[#allocation5 + $0x2d0] sm:$0xff] }
 0x14b   : > { %v900_v32 = vld [vmem:[#allocation5 + $0x2f0] sm:$0xff]  ;;  %v1692_v37 = vpack.c.bf16 %v898_v28, %v894_v27  ;;  %v1374_v27 = vld [vmem:[%s2385_s6] sm:$0xf] }
 0x14c   : > { %v1820_v38 = vpack.c.bf16 %v900_v32, %v896_v31  ;;  %1377 = vperm.xlu1 %1972, %v1374_v27   ;;  %v1366_v28 = vld [vmem:[%s2384_s5] sm:$0xf]  ;;  %v972_v27 = vld [vmem:[#allocation5 + $0x530] sm:$0xff] }
 0x14d   : > { %1673 = vmatpush1.bf16.msra.mxu0 %v1672_v39  ;;  %1801 = vmatpush1.bf16.msra.mxu1 %v1800_v40  ;;  %v902_v39 = vld [vmem:[#allocation5 + $0x300] sm:$0xff] }
 0x14e   : > { %1675 = vmatprep.subr.bf16.mxu0 %v1674_v43  ;;  %1803 = vmatprep.subr.bf16.mxu1 %v1802_v44  ;;  %v906_v40 = vld [vmem:[#allocation5 + $0x320] sm:$0xff]  ;;  %v904_v43 = vld [vmem:[#allocation5 + $0x310] sm:$0xff] }
 0x14f   : > { %v908_v44 = vld [vmem:[#allocation5 + $0x330] sm:$0xff]  ;;  %v1696_v49 = vpack.c.bf16 %v906_v40, %v902_v39  ;;  %v938_v32 = vld [vmem:[#allocation5 + $0x420] sm:$0xff] }
 0x150   : > { %v1824_v50 = vpack.c.bf16 %v908_v44, %v904_v43  ;;  %1369 = vperm.xlu1 %1972, %v1366_v28   ;;  %v947_v43 = vld [vmem:[#allocation5 + $0x468] sm:$0xff]  ;;  %v945_v44 = vld [vmem:[#allocation5 + $0x458] sm:$0xff] }
 0x151   : > { %1677 = vmatpush1.bf16.msra.mxu0 %v1676_v51  ;;  %1805 = vmatpush1.bf16.msra.mxu1 %v1804_v52  ;;  %v910_v51 = vld [vmem:[#allocation5 + $0x340] sm:$0xff]  ;;  %v975_v28 = vld [vmem:[#allocation5 + $0x548] sm:$0xff] }
 0x152   : > { %1679 = vmatprep.subr.bf16.mxu0 %v1678_v55  ;;  %1807 = vmatprep.subr.bf16.mxu1 %v1806_v56  ;;  %v914_v52 = vld [vmem:[#allocation5 + $0x360] sm:$0xff]  ;;  %v912_v55 = vld [vmem:[#allocation5 + $0x350] sm:$0xff] }
 0x153   : > { %v916_v56 = vld [vmem:[#allocation5 + $0x370] sm:$0xff]  ;;  %v1700_v61 = vpack.c.bf16 %v914_v52, %v910_v51 }
 0x154   : > { %v1828_v62 = vpack.c.bf16 %v916_v56, %v912_v55  ;;  %v944_v51 = vld [vmem:[#allocation5 + $0x450] sm:$0xff]  ;;  %v955_v55 = vld [vmem:[#allocation5 + $0x4a8] sm:$0xff]  ;;  %v953_v56 = vld [vmem:[#allocation5 + $0x498] sm:$0xff] }
 0x155   : > { %1681 = vmatpush1.bf16.msra.mxu0 %v1680_v63  ;;  %1809 = vmatpush1.bf16.msra.mxu1 %v1808_v0  ;;  %v918_v63 = vld [vmem:[#allocation5 + $0x380] sm:$0xff]  ;;  %v1702_v0 = vpack.c.bf16 %v923_v58, %v919_v57  ;;  %v948_v52 = vld [vmem:[#allocation5 + $0x470] sm:$0xff]  ;;  %v957_v57 = vld [vmem:[#allocation5 + $0x4b8] sm:$0xff] }
 0x156   : > { %1683 = vmatprep.subr.bf16.mxu0 %v1682_v3  ;;  %1811 = vmatprep.subr.bf16.mxu1 %v1810_v4  ;;  %v920_v3 = vld [vmem:[#allocation5 + $0x390] sm:$0xff]  ;;  %v1704_v5 = vpack.c.bf16 %v922_v2, %v918_v63  ;;  %v1844_v59 = vpack.c.bf16 %v948_v52, %v944_v51  ;;  %v1846_v63 = vpack.c.bf16 %v957_v57, %v953_v56  ;;  %v959_v2 = vld [vmem:[#allocation5 + $0x4c8] sm:$0xff]  ;;  %v990_v57 = vld [vmem:[#allocation5 + $0x5c0] sm:$0xff] }
 0x157   : > { %v924_v4 = vld [vmem:[#allocation5 + $0x3b0] sm:$0xff]  ;;  %v991_v52 = vld [vmem:[#allocation5 + $0x5c8] sm:$0xff] }
 0x158   : > { %v1832_v6 = vpack.c.bf16 %v924_v4, %v920_v3  ;;  %v963_v3 = vld [vmem:[#allocation5 + $0x4e8] sm:$0xff]  ;;  %v961_v4 = vld [vmem:[#allocation5 + $0x4d8] sm:$0xff]  ;;  %v988_v51 = vld [vmem:[#allocation5 + $0x5b0] sm:$0xff] }
 0x159   : > { %1685 = vmatpush1.bf16.msra.mxu0 %v1684_v11  ;;  %1813 = vmatpush1.bf16.msra.mxu1 %v1812_v12  ;;  %v933_v11 = vld [vmem:[#allocation5 + $0x3f8] sm:$0xff]  ;;  %v926_v12 = vld [vmem:[#allocation5 + $0x3c0] sm:$0xff] }
 0x15a   : > { %1687 = vmatprep.subr.bf16.mxu0 %v1686_v15  ;;  %1815 = vmatprep.subr.bf16.mxu1 %v1814_v16  ;;  %v1834_v14 = vpack.c.bf16 %v933_v11, %v929_v9  ;;  %v1708_v15 = vpack.c.bf16 %v930_v13, %v926_v12  ;;  %v928_v16 = vld [vmem:[#allocation5 + $0x3d0] sm:$0xff]  ;;  %v962_v9 = vld [vmem:[#allocation5 + $0x4e0] sm:$0xff] }
 0x15b   : > { %v1836_v18 = vpack.c.bf16 %v932_v17, %v928_v16  ;;  %v960_v12 = vld [vmem:[#allocation5 + $0x4d0] sm:$0xff]  ;;  %v969_v16 = vld [vmem:[#allocation5 + $0x518] sm:$0xff] }
 0x15c   : > { %v964_v13 = vld [vmem:[#allocation5 + $0x4f0] sm:$0xff]  ;;  %v973_v17 = vld [vmem:[#allocation5 + $0x538] sm:$0xff] }
 0x15d   : > { %1689 = vmatpush1.bf16.msra.mxu0 %v1688_v24  ;;  %1817 = vmatpush1.bf16.msra.mxu1 %v1816_v26  ;;  %v941_v24 = vld [vmem:[#allocation5 + $0x438] sm:$0xff]  ;;  %v1852_v19 = vpack.c.bf16 %v964_v13, %v960_v12  ;;  %v1011_v12 = vld [vmem:[#allocation5 + $0x668] sm:$0xff] }
 0x15e   : > { %1691 = vmatprep.subr.bf16.mxu0 %v1690_v29  ;;  %1819 = vmatprep.subr.bf16.mxu1 %v1818_v30  ;;  %v1838_v26 = vpack.c.bf16 %v941_v24, %v937_v22  ;;  %v367_v29 = vpop.permute.xlu0 %366  ;;  %v934_v30 = vld [vmem:[#allocation5 + $0x400] sm:$0xff]  ;;  %v1854_v24 = vpack.c.bf16 %v973_v17, %v969_v16  ;;  %v1009_v13 = vld [vmem:[#allocation5 + $0x658] sm:$0xff] }
 0x15f   : > { %v447_v31 = vadd.f32 %v2311_v20, %v367_v29  ;;  %v449_v35 = vadd.f32 %v2313_v25, %v367_v29  ;;  %v1712_v48 = vpack.c.bf16 %v938_v32, %v934_v30  ;;  %v1840_v20 = vpack.c.bf16 %v940_v34, %v936_v33  ;;  %v951_v25 = vld [vmem:[#allocation5 + $0x488] sm:$0xff]  ;;  %v970_v22 = vld [vmem:[#allocation5 + $0x520] sm:$0xff]  ;;  %v977_v30 = vld [vmem:[#allocation5 + $0x558] sm:$0xff] }
 0x160   : > { %v979_v29 = vld [vmem:[#allocation5 + $0x568] sm:$0xff]  ;;  %v1728_v32 = vpack.c.bf16 %v970_v22, %v966_v21  ;;  %v974_v34 = vld [vmem:[#allocation5 + $0x540] sm:$0xff]  ;;  %v1008_v22 = vld [vmem:[#allocation5 + $0x650] sm:$0xff] }
 0x161   : > { %1693 = vmatpush1.bf16.msra.mxu0 %v1692_v37  ;;  %1821 = vmatpush1.bf16.msra.mxu1 %v1820_v38  ;;  %v943_v38 = vld [vmem:[#allocation5 + $0x448] sm:$0xff]  ;;  %v1006_v17 = vld [vmem:[#allocation5 + $0x640] sm:$0xff] }
 0x162   : > { %1695 = vmatprep.subr.bf16.mxu0 %v1694_v41  ;;  %1823 = vmatprep.subr.bf16.mxu1 %v1822_v42 }
 0x165   : > { %1697 = vmatpush1.bf16.msra.mxu0 %v1696_v49  ;;  %1825 = vmatpush1.bf16.msra.mxu1 %v1824_v50  ;;  %v942_v49 = vld [vmem:[#allocation5 + $0x440] sm:$0xff] }
 0x166   : > { %1699 = vmatprep.subr.bf16.mxu0 %v1698_v53  ;;  %1827 = vmatprep.subr.bf16.mxu1 %v1826_v54  ;;  %v946_v50 = vld [vmem:[#allocation5 + $0x460] sm:$0xff]  ;;  %v1714_v53 = vpack.c.bf16 %v947_v43, %v943_v38  ;;  %v1842_v54 = vpack.c.bf16 %v949_v45, %v945_v44  ;;  %v976_v38 = vld [vmem:[#allocation5 + $0x550] sm:$0xff]  ;;  %v985_v43 = vld [vmem:[#allocation5 + $0x598] sm:$0xff] }
 0x167   : > { %v1716_v58 = vpack.c.bf16 %v946_v50, %v942_v49  ;;  %v989_v44 = vld [vmem:[#allocation5 + $0x5b8] sm:$0xff]  ;;  %v984_v50 = vld [vmem:[#allocation5 + $0x590] sm:$0xff] }
 0x168   : > { %v1862_v49 = vpack.c.bf16 %v989_v44, %v985_v43  ;;  %v1864_v56 = vpack.c.bf16 %v988_v51, %v984_v50  ;;  %v1022_v44 = vld [vmem:[#allocation5 + $0x6c0] sm:$0xff]  ;;  %v1035_v50 = vld [vmem:[#allocation5 + $0x728] sm:$0xff]  ;;  %v1033_v51 = vld [vmem:[#allocation5 + $0x718] sm:$0xff] }
 0x169   : > { %1701 = vmatpush1.bf16.msra.mxu0 %v1700_v61  ;;  %1829 = vmatpush1.bf16.msra.mxu1 %v1828_v62  ;;  %v954_v61 = vld [vmem:[#allocation5 + $0x4a0] sm:$0xff]  ;;  %v1718_v62 = vpack.c.bf16 %v955_v55, %v951_v25  ;;  %v995_v25 = vld [vmem:[#allocation5 + $0x5e8] sm:$0xff] }
 0x16a   : > { %1703 = vmatprep.subr.bf16.mxu0 %v1702_v0  ;;  %1831 = vmatprep.subr.bf16.mxu1 %v1830_v1  ;;  %v952_v0 = vld [vmem:[#allocation5 + $0x490] sm:$0xff] }
 0x16b   : > { %v956_v1 = vld [vmem:[#allocation5 + $0x4b0] sm:$0xff] }
 0x16c   : > { %v1848_v7 = vpack.c.bf16 %v956_v1, %v952_v0  ;;  %v1003_v0 = vld [vmem:[#allocation5 + $0x628] sm:$0xff]  ;;  %v1001_v1 = vld [vmem:[#allocation5 + $0x618] sm:$0xff] }
 0x16d   : > { %1705 = vmatpush1.bf16.msra.mxu0 %v1704_v5  ;;  %1833 = vmatpush1.bf16.msra.mxu1 %v1832_v6  ;;  %v965_v5 = vld [vmem:[#allocation5 + $0x4f8] sm:$0xff]  ;;  %v1720_v6 = vpack.c.bf16 %v954_v61, %v950_v60  ;;  %v992_v61 = vld [vmem:[#allocation5 + $0x5d0] sm:$0xff] }
 0x16e   : > { %1707 = vmatprep.subr.bf16.mxu0 %v1706_v10  ;;  %1835 = vmatprep.subr.bf16.mxu1 %v1834_v14  ;;  %v1722_v10 = vpack.c.bf16 %v963_v3, %v959_v2  ;;  %v1850_v11 = vpack.c.bf16 %v965_v5, %v961_v4  ;;  %v967_v14 = vld [vmem:[#allocation5 + $0x508] sm:$0xff]  ;;  %v1005_v2 = vld [vmem:[#allocation5 + $0x638] sm:$0xff]  ;;  %v998_v5 = vld [vmem:[#allocation5 + $0x600] sm:$0xff] }
 0x171   : > { %1709 = vmatpush1.bf16.msra.mxu0 %v1708_v15  ;;  %1837 = vmatpush1.bf16.msra.mxu1 %v1836_v18  ;;  %v971_v15 = vld [vmem:[#allocation5 + $0x528] sm:$0xff]  ;;  %v1724_v18 = vpack.c.bf16 %v962_v9, %v958_v8  ;;  %v1870_v8 = vpack.c.bf16 %v1005_v2, %v1001_v1  ;;  %v1000_v9 = vld [vmem:[#allocation5 + $0x610] sm:$0xff]  ;;  %v1038_v2 = vld [vmem:[#allocation5 + $0x740] sm:$0xff] }
 0x172   : > { %1711 = vmatprep.subr.bf16.mxu0 %v1710_v23  ;;  %1839 = vmatprep.subr.bf16.mxu1 %v1838_v26  ;;  %v1726_v23 = vpack.c.bf16 %v971_v15, %v967_v14  ;;  %v968_v26 = vld [vmem:[#allocation5 + $0x510] sm:$0xff]  ;;  %v1013_v14 = vld [vmem:[#allocation5 + $0x678] sm:$0xff] }
 0x173   : > { %v1856_v33 = vpack.c.bf16 %v972_v27, %v968_v26  ;;  %v1874_v21 = vpack.c.bf16 %v1013_v14, %v1009_v13  ;;  %v1019_v26 = vld [vmem:[#allocation5 + $0x6a8] sm:$0xff]  ;;  %v1017_v27 = vld [vmem:[#allocation5 + $0x698] sm:$0xff]  ;;  %v1046_v14 = vld [vmem:[#allocation5 + $0x780] sm:$0xff] }
 0x207   : > { %v726_v36 = vpop.f32.mrb[2].mxu0  ;;  %v797_v37 = vpop.f32.mrb[2].mxu1 }
 0x208   : > { %v802_v39 = vmul.f32 %v726_v36, %v447_v31  ;;  %v2323_v40 = vmul.f32 %v797_v37, %v447_v31  ;;  %v728_v41 = vpop.f32.mrb[3].mxu0  ;;  %v799_v42 = vpop.f32.mrb[3].mxu1  ;;  %v981_v31 = vld [vmem:[#allocation5 + $0x578] sm:$0xff]  ;;  %v1730_v36 = vpack.c.bf16 %v979_v29, %v975_v28 }
 0x209   : > { %v803_v46 = vmul.f32 %v728_v41, %v449_v35  ;;  %v805_v47 = vmul.f32 %v799_v42, %v449_v35  ;;  %v978_v35 = vld [vmem:[#allocation5 + $0x560] sm:$0xff]  ;;  %v1858_v37 = vpack.c.bf16 %v981_v31, %v977_v30  ;;  %v983_v41 = vld [vmem:[#allocation5 + $0x588] sm:$0xff]  ;;  %v1021_v28 = vld [vmem:[#allocation5 + $0x6b8] sm:$0xff] }
 0x20a   : > { %v987_v42 = vld [vmem:[#allocation5 + $0x5a8] sm:$0xff]  ;;  %v1732_v45 = vpack.c.bf16 %v978_v35, %v974_v34  ;;  %v1014_v31 = vld [vmem:[#allocation5 + $0x680] sm:$0xff]  ;;  %v1878_v34 = vpack.c.bf16 %v1021_v28, %v1017_v27  ;;  %v1016_v35 = vld [vmem:[#allocation5 + $0x690] sm:$0xff] }
 0x20b   : > { %1126 = vmatprep.mubr.f32.mxu0 %v803_v46  ;;  %1268 = vmatprep.mubr.f32.mxu1 %v803_v46  ;;  %v1054_v28 = vld [vmem:[#allocation5 + $0x7c0] sm:$0xff] }
 0x20c   : > { %1127 = vmatmul.mubr.f32.vlgmr.msra.gmra.mrb[4].mxu0 %v802_v39  ;;  %1269 = vmatmul.mubr.f32.vlgmr.msra.gmra.mrb[4].mxu1 %v802_v39  ;;  %v980_v39 = vld [vmem:[#allocation5 + $0x570] sm:$0xff] }
 0x20d   : > { %1713 = vmatpush1.bf16.msra.mxu0 %v1712_v48  ;;  %1841 = vmatpush1.bf16.msra.mxu1 %v1840_v20  ;;  %v1860_v46 = vpack.c.bf16 %v980_v39, %v976_v38  ;;  %v986_v48 = vld [vmem:[#allocation5 + $0x5a0] sm:$0xff]  ;;  %v1734_v20 = vpack.c.bf16 %v987_v42, %v983_v41  ;;  %v1027_v38 = vld [vmem:[#allocation5 + $0x6e8] sm:$0xff]  ;;  %v1025_v39 = vld [vmem:[#allocation5 + $0x6d8] sm:$0xff] }
 0x20e   : > { %1197 = vmatprep.mubr.f32.mxu0 %v805_v47  ;;  %1339 = vmatprep.mubr.f32.mxu1 %v805_v47  ;;  %v982_v47 = vld [vmem:[#allocation5 + $0x580] sm:$0xff]  ;;  %v1029_v41 = vld [vmem:[#allocation5 + $0x6f8] sm:$0xff] }
 0x20f   : > { %1715 = vmatprep.subr.bf16.mxu0 %v1714_v53  ;;  %1843 = vmatprep.subr.bf16.mxu1 %v1842_v54  ;;  %v993_v53 = vld [vmem:[#allocation5 + $0x5d8] sm:$0xff]  ;;  %v1736_v55 = vpack.c.bf16 %v986_v48, %v982_v47  ;;  %v1882_v47 = vpack.c.bf16 %v1029_v41, %v1025_v39  ;;  %v1024_v48 = vld [vmem:[#allocation5 + $0x6d0] sm:$0xff] }
 0x210   : > { %v997_v54 = vld [vmem:[#allocation5 + $0x5f8] sm:$0xff] }
 0x211   : > { %1717 = vmatpush1.bf16.msra.mxu0 %v1716_v58  ;;  %1845 = vmatpush1.bf16.msra.mxu1 %v1844_v59  ;;  %v994_v58 = vld [vmem:[#allocation5 + $0x5e0] sm:$0xff]  ;;  %v1738_v59 = vpack.c.bf16 %v995_v25, %v991_v52  ;;  %v1866_v60 = vpack.c.bf16 %v997_v54, %v993_v53  ;;  %v1037_v52 = vld [vmem:[#allocation5 + $0x738] sm:$0xff] }
 0x212   : > { %1719 = vmatprep.subr.bf16.mxu0 %v1718_v62  ;;  %1847 = vmatprep.subr.bf16.mxu1 %v1846_v63  ;;  %v996_v62 = vld [vmem:[#allocation5 + $0x5f0] sm:$0xff]  ;;  %v999_v63 = vld [vmem:[#allocation5 + $0x608] sm:$0xff]  ;;  %v1740_v3 = vpack.c.bf16 %v994_v58, %v990_v57  ;;  %v1030_v54 = vld [vmem:[#allocation5 + $0x700] sm:$0xff]  ;;  %v1886_v57 = vpack.c.bf16 %v1037_v52, %v1033_v51  ;;  %v1378_v51 = vpop.permute.xlu1 %1377 }
 0x213   : > { %v1868_v4 = vpack.c.bf16 %v996_v62, %v992_v61  ;;  %v1032_v58 = vld [vmem:[#allocation5 + $0x710] sm:$0xff]  ;;  %v1043_v61 = vld [vmem:[#allocation5 + $0x768] sm:$0xff]  ;;  %v1041_v62 = vld [vmem:[#allocation5 + $0x758] sm:$0xff] }
 0x215   : > { %1721 = vmatpush1.bf16.msra.mxu0 %v1720_v6  ;;  %1849 = vmatpush1.bf16.msra.mxu1 %v1848_v7  ;;  %v1002_v6 = vld [vmem:[#allocation5 + $0x620] sm:$0xff]  ;;  %v1742_v7 = vpack.c.bf16 %v1003_v0, %v999_v63  ;;  %v1045_v63 = vld [vmem:[#allocation5 + $0x778] sm:$0xff] }
 0x216   : > { %1723 = vmatprep.subr.bf16.mxu0 %v1722_v10  ;;  %1851 = vmatprep.subr.bf16.mxu1 %v1850_v11  ;;  %v1004_v10 = vld [vmem:[#allocation5 + $0x630] sm:$0xff]  ;;  %v1007_v11 = vld [vmem:[#allocation5 + $0x648] sm:$0xff]  ;;  %v1744_v15 = vpack.c.bf16 %v1002_v6, %v998_v5  ;;  %v1890_v5 = vpack.c.bf16 %v1045_v63, %v1041_v62 }
 0x217   : > { %v1872_v16 = vpack.c.bf16 %v1004_v10, %v1000_v9  ;;  %v1040_v6 = vld [vmem:[#allocation5 + $0x750] sm:$0xff]  ;;  %v1051_v9 = vld [vmem:[#allocation5 + $0x7a8] sm:$0xff]  ;;  %v1049_v10 = vld [vmem:[#allocation5 + $0x798] sm:$0xff] }
 0x219   : > { %1725 = vmatpush1.bf16.msra.mxu0 %v1724_v18  ;;  %1853 = vmatpush1.bf16.msra.mxu1 %v1852_v19  ;;  %v1010_v18 = vld [vmem:[#allocation5 + $0x660] sm:$0xff]  ;;  %v1746_v19 = vpack.c.bf16 %v1011_v12, %v1007_v11  ;;  %v1053_v11 = vld [vmem:[#allocation5 + $0x7b8] sm:$0xff] }
 0x21a   : > { %1727 = vmatprep.subr.bf16.mxu0 %v1726_v23  ;;  %1855 = vmatprep.subr.bf16.mxu1 %v1854_v24  ;;  %v1012_v23 = vld [vmem:[#allocation5 + $0x670] sm:$0xff]  ;;  %v1015_v24 = vld [vmem:[#allocation5 + $0x688] sm:$0xff]  ;;  %v1748_v29 = vpack.c.bf16 %v1010_v18, %v1006_v17  ;;  %v1894_v17 = vpack.c.bf16 %v1053_v11, %v1049_v10 }
 0x21b   : > { %v1876_v30 = vpack.c.bf16 %v1012_v23, %v1008_v22  ;;  %v1048_v18 = vld [vmem:[#allocation5 + $0x790] sm:$0xff]  ;;  %v1059_v22 = vld [vmem:[#allocation5 + $0x7e8] sm:$0xff]  ;;  %v1057_v23 = vld [vmem:[#allocation5 + $0x7d8] sm:$0xff] }
 0x21d   : > { %1729 = vmatpush1.bf16.msra.mxu0 %v1728_v32  ;;  %1857 = vmatpush1.bf16.msra.mxu1 %v1856_v33  ;;  %v1018_v32 = vld [vmem:[#allocation5 + $0x6a0] sm:$0xff]  ;;  %v1750_v33 = vpack.c.bf16 %v1019_v26, %v1015_v24  ;;  %v1061_v24 = vld [vmem:[#allocation5 + $0x7f8] sm:$0xff] }
 0x21e   : > { %1731 = vmatprep.subr.bf16.mxu0 %v1730_v36  ;;  %1859 = vmatprep.subr.bf16.mxu1 %v1858_v37  ;;  %v1020_v36 = vld [vmem:[#allocation5 + $0x6b0] sm:$0xff]  ;;  %v1023_v37 = vld [vmem:[#allocation5 + $0x6c8] sm:$0xff]  ;;  %v1752_v42 = vpack.c.bf16 %v1018_v32, %v1014_v31  ;;  %v1058_v31 = vld [vmem:[#allocation5 + $0x7e0] sm:$0xff] }
 0x21f   : > { %v1880_v43 = vpack.c.bf16 %v1020_v36, %v1016_v35  ;;  %v1056_v32 = vld [vmem:[#allocation5 + $0x7d0] sm:$0xff]  ;;  %v2113_v36 = vmov 839922192  }
 0x221   : > { %1733 = vmatpush1.bf16.msra.mxu0 %v1732_v45  ;;  %1861 = vmatpush1.bf16.msra.mxu1 %v1860_v46  ;;  %v1026_v45 = vld [vmem:[#allocation5 + $0x6e0] sm:$0xff]  ;;  %v1754_v46 = vpack.c.bf16 %v1027_v38, %v1023_v37  ;;  %v1380_v37 = vunpack.c.l.s4 %v2113_v36  ;;  %v1382_v38 = vlaneseq }
 0x222   : > { %1735 = vmatprep.subr.bf16.mxu0 %v1734_v20  ;;  %1863 = vmatprep.subr.bf16.mxu1 %v1862_v49  ;;  %v1028_v20 = vld [vmem:[#allocation5 + $0x6f0] sm:$0xff]  ;;  %v1031_v49 = vld [vmem:[#allocation5 + $0x708] sm:$0xff]  ;;  %v1756_v25 = vpack.c.bf16 %v1026_v45, %v1022_v44 }
 0x223   : > { %v1884_v53 = vpack.c.bf16 %v1028_v20, %v1024_v48  ;;  %v1381_v20 = vunpack.c.0.s8 %v1380_v37 }
 0x225   : > { %1737 = vmatpush1.bf16.msra.mxu0 %v1736_v55  ;;  %1865 = vmatpush1.bf16.msra.mxu1 %v1864_v56  ;;  %v1034_v55 = vld [vmem:[#allocation5 + $0x720] sm:$0xff]  ;;  %v1758_v56 = vpack.c.bf16 %v1035_v50, %v1031_v49  ;;  %v1383_v49 = vshrl.u32 %v1382_v38, 7 }
 0x226   : > { %1739 = vmatprep.subr.bf16.mxu0 %v1738_v59  ;;  %1867 = vmatprep.subr.bf16.mxu1 %v1866_v60  ;;  %v1036_v59 = vld [vmem:[#allocation5 + $0x730] sm:$0xff]  ;;  %v1039_v60 = vld [vmem:[#allocation5 + $0x748] sm:$0xff]  ;;  %v1760_v0 = vpack.c.bf16 %v1034_v55, %v1030_v54 }
 0x227   : > { %v1888_v1 = vpack.c.bf16 %v1036_v59, %v1032_v58 }
 0x229   : > { %1741 = vmatpush1.bf16.msra.mxu0 %v1740_v3  ;;  %1869 = vmatpush1.bf16.msra.mxu1 %v1868_v4  ;;  %v1042_v3 = vld [vmem:[#allocation5 + $0x760] sm:$0xff]  ;;  %v1762_v4 = vpack.c.bf16 %v1043_v61, %v1039_v60  ;;  %v1370_v61 = vpop.permute.xlu1 %1369 }
 0x22a   : > { %1743 = vmatprep.subr.bf16.mxu0 %v1742_v7  ;;  %1871 = vmatprep.subr.bf16.mxu1 %v1870_v8  ;;  %v1044_v7 = vld [vmem:[#allocation5 + $0x770] sm:$0xff]  ;;  %v1047_v8 = vld [vmem:[#allocation5 + $0x788] sm:$0xff]  ;;  %v1764_v12 = vpack.c.bf16 %v1042_v3, %v1038_v2 }
 0x22b   : > { %v1892_v13 = vpack.c.bf16 %v1044_v7, %v1040_v6 }
 0x22d   : > { %1745 = vmatpush1.bf16.msra.mxu0 %v1744_v15  ;;  %1873 = vmatpush1.bf16.msra.mxu1 %v1872_v16  ;;  %v1050_v15 = vld [vmem:[#allocation5 + $0x7a0] sm:$0xff]  ;;  %v1766_v16 = vpack.c.bf16 %v1051_v9, %v1047_v8 }
 0x22e   : > { %1747 = vmatprep.subr.bf16.mxu0 %v1746_v19  ;;  %1875 = vmatprep.subr.bf16.mxu1 %v1874_v21  ;;  %v1052_v19 = vld [vmem:[#allocation5 + $0x7b0] sm:$0xff]  ;;  %v1055_v21 = vld [vmem:[#allocation5 + $0x7c8] sm:$0xff]  ;;  %v1768_v26 = vpack.c.bf16 %v1050_v15, %v1046_v14 }
 0x22f   : > { %v1896_v27 = vpack.c.bf16 %v1052_v19, %v1048_v18 }
 0x231   : > { %1749 = vmatpush1.bf16.msra.mxu0 %v1748_v29  ;;  %1877 = vmatpush1.bf16.msra.mxu1 %v1876_v30  ;;  %v1770_v29 = vpack.c.bf16 %v1059_v22, %v1055_v21  ;;  %v1898_v30 = vpack.c.bf16 %v1061_v24, %v1057_v23 }
 0x232   : > { %1751 = vmatprep.subr.bf16.mxu0 %v1750_v33  ;;  %1879 = vmatprep.subr.bf16.mxu1 %v1878_v34  ;;  %v1060_v33 = vld [vmem:[#allocation5 + $0x7f0] sm:$0xff]  ;;  %v1772_v34 = vpack.c.bf16 %v1058_v31, %v1054_v28 }
 0x233   : > { %v1900_v35 = vpack.c.bf16 %v1060_v33, %v1056_v32 }
 0x235   : > { %1753 = vmatpush1.bf16.msra.mxu0 %v1752_v42  ;;  %1881 = vmatpush1.bf16.msra.mxu1 %v1880_v43 }
 0x236   : > { %1755 = vmatprep.subr.bf16.mxu0 %v1754_v46  ;;  %1883 = vmatprep.subr.bf16.mxu1 %v1882_v47 }
 0x239   : > { %1757 = vmatpush1.bf16.msra.mxu0 %v1756_v25  ;;  %1885 = vmatpush1.bf16.msra.mxu1 %v1884_v53  ;;  %v1978_v53 = vld [vmem:[%s2290_s27] sm:$0xff]  ;;  %s1517_s27 = sshll.u32 %s2186_s13, 7  ;;  %s2114_s13 = smov [#allocation7]  }
 0x23a   : > { %1759 = vmatprep.subr.bf16.mxu0 %v1758_v56  ;;  %1887 = vmatprep.subr.bf16.mxu1 %v1886_v57  ;;  %s2335_s17 = scalar_lea.hbm %s2388_s9, %s1517_s27  ;;  %s2039_s23 = sshll.u32 %s2114_s13, 4  ;;  %s2040_s23 = int_to_ptr.vmem [resolvable:$false] %s2039_s23 }
 0x23b   : > { %s2041_s11 = scalar_lea.vmem %s2040_s23, 256  ;;  %p2042_p4 = scmp.lt.s32.totalorder %s2337_s29, %s2040_s23 }
 0x23c   : > { %p2043_p7 = scmp.lt.s32.totalorder %s2041_s11, %s2035_s25 }
 0x23d   : > { %1761 = vmatpush1.bf16.msra.mxu0 %v1760_v0  ;;  %1889 = vmatpush1.bf16.msra.mxu1 %v1888_v1 }
 0x23e   : > { %1763 = vmatprep.subr.bf16.mxu0 %v1762_v4  ;;  %1891 = vmatprep.subr.bf16.mxu1 %v1890_v5  ;;  %p2044_p8 = por %p2043_p7, %p2042_p4 }
 0x240   : > { %p2045_p11 = pnand %p2044_p8, %p2038_p3 }
 0x241   : > { %1765 = vmatpush1.bf16.msra.mxu0 %v1764_v12  ;;  %1893 = vmatpush1.bf16.msra.mxu1 %v1892_v13 }
 0x242   : > { %1767 = vmatprep.subr.bf16.mxu0 %v1766_v16  ;;  %1895 = vmatprep.subr.bf16.mxu1 %v1894_v17 }
 0x245   : > { %1769 = vmatpush1.bf16.msra.mxu0 %v1768_v26  ;;  %1897 = vmatpush1.bf16.msra.mxu1 %v1896_v27 }
 0x246   : > { %1771 = vmatprep.subr.bf16.mxu0 %v1770_v29  ;;  %1899 = vmatprep.subr.bf16.mxu1 %v1898_v30 }
 0x249   : > { %1773 = vmatpush1.bf16.msra.mxu0 %v1772_v34  ;;  %1901 = vmatpush1.bf16.msra.mxu1 %v1900_v35 }
 0x24c   : > { %1198 = vmatmul.mubr.f32.vlgmr.msra.gmra.mrb[4].mxu0 %v2323_v40  ;;  %1340 = vmatmul.mubr.f32.vlgmr.msra.gmra.mrb[4].mxu1 %v2323_v40  ;;  %v1384_v40 = vsub.s32 %v1381_v20, %v1383_v49 }
 0x24e   : > { %v1385_v52 = vrot.slane %v1378_v51, %v1384_v40 }
 0x250   : > { %v1387_v54 = vmul.f32 %v1978_v53, %v1385_v52 }
 0x252   : > { %v1389_v0 = vcombine.high %v1387_v54, %v1387_v54 }
 0x31f   : > { %v1199_v39 = vpop.f32.mrb[4].mxu0  ;;  %v1341_v41 = vpop.f32.mrb[4].mxu1 }
 0x320   : > { %v1346_v42 = vmul.f32 %v1199_v39, %v1199_v39  ;;  %v1348_v43 = vmul.f32 %v1341_v41, %v1341_v41  ;;  %v1201_v44 = vpop.f32.mrb[5].mxu0  ;;  %v1343_v45 = vpop.f32.mrb[5].mxu1 }
 0x321   : > { %v1347_v46 = vmul.f32 %v1201_v44, %v1201_v44  ;;  %v1349_v47 = vmul.f32 %v1343_v45, %v1343_v45 }
 0x322   : > { %v1350_v48 = vadd.f32 %v1348_v43, %v1346_v42 }
 0x323   : > { %v1351_v50 = vadd.f32 %v1349_v47, %v1347_v46 }
 0x324   : > { %1974 = vrsqrt.f32 %v1350_v48  ;;  %vm1354_vm2 = vcmp.eq.f32.partialorder %v1350_v48, inf  ;;  %v1357_v57 = vand.u32 2147483648, %v1350_v48  ;;  %vm1356_vm3 = vcmp.eq.f32.partialorder %v1350_v48, 0.0 }
 0x325   : > { %1976 = vrsqrt.f32 %v1351_v50  ;;  %vm1361_vm4 = vcmp.eq.f32.partialorder %v1351_v50, inf  ;;  %v1364_v60 = vand.u32 2147483648, %v1351_v50  ;;  %vm1363_vm5 = vcmp.eq.f32.partialorder %v1351_v50, 0.0 }
 0x32e   : > { %v1975_v25 = vpop.eup %1974 }
 0x32f   : > { %v1977_v55 = vpop.eup %1976  ;;  %v1353_v56 = vmul.f32 %v1975_v25, %v1350_v48 }
 0x330   : > { %v1360_v58 = vmul.f32 %v1977_v55, %v1351_v50 }
 0x331   : > { %v1355_v59 = vsel %vm1354_vm2, %v1350_v48, %v1353_v56 }
 0x332   : > { %v1358_v62 = vsel %vm1356_vm3, %v1357_v57, %v1355_v59  ;;  %v1362_v63 = vsel %vm1361_vm4, %v1351_v50, %v1360_v58 }
 0x333   : > { %v1365_v1 = vsel %vm1363_vm5, %v1364_v60, %v1362_v63  ;;  %v1372_v2 = vmul.f32 %v1370_v61, %v1358_v62 }
 0x334   : > { %v1373_v3 = vmul.f32 %v1370_v61, %v1365_v1 }
 0x335   : > { %v1391_v4 = vadd.f32 %v1387_v54, %v1372_v2 }
 0x336   : > { %v1392_v5 = vadd.f32 %v1389_v0, %v1373_v3 }
 0x338   : > { %v1395_v6 = vcombine.low %v1391_v4, %v1392_v5 }
 0x33a   : > { %1397 = vst [vmem:[%s355_s28] sm:$0xff] %v1395_v6 }
 0x33b   : > { %2048 = shalt.err (!%p2045_p11)
}
 0x33c   : > { %s2049_s15 = scalar_lea.hbm %s2335_s17, 128  ;;  %s2053_s24 = scalar_lea.hbm %s2388_s9, 256 }
 0x33d   : > { %p2050_p13 = scmp.ne.s32.totalorder %s2335_s17, %s2049_s15  ;;  %p2054_p6 = scmp.lt.u32.totalorder %s2335_s17, %s2388_s9 }
 0x33e   : > { %p2055_p9 = scmp.lt.u32.totalorder %s2053_s24, %s2049_s15  ;;  %p2057_p12 = scmp.lt.u32.totalorder %s2049_s15, %s2335_s17 }
 0x33f   : > { %p2051_p5 = pnand %p2050_p13, %p2407_p1 }
 0x340   : > { %p2056_p10 = por %p2055_p9, %p2054_p6 }
 0x341   : > { %p2052_p0 = pneg %p2051_p5 }
 0x342   : > { %p2058_p2 = por %p2057_p12, %p2056_p10 }
 0x344   : > { %p2059_p3 = pnand %p2058_p2, %p2052_p0 }
 0x346   : > { %2062 = shalt.err (!%p2059_p3)
}
 0x347   : > { %1914 = dma.vmem_to_hbm [thread:$0]  (%p2407_p1), %s2337_s29, 128, %s2335_s17, %s1399_s22  }
 0x348 PF: > { %p1931_p4 = scmp.ge.s32.totalorder %s2105_s12, 2  ;;  %s1425_s28 = sand.u32 1, %s2093_s30  }
 0x349   : > { %p2408_p7 = scmp.ne.s32.totalorder %s2399_s20, 0  ;;  %s1426_s14 = scalar_lea.sflag [#allocation4], %s1425_s28 }
 0x34b   : > { %p1924_p8 = pnand %p1931_p4, %p2408_p7 }
 0x34d   : > { %2088 = dma.done.wait (!%p1924_p8), %s1426_s14, 128  }
 0x34e   : > { %2090 = vsyncadd (!%p1924_p8), %s1426_s14, 4294967168  ;;  %s2409_s12 = sld [smem:[#allocation12_spill]]  ;;  %s2410_s16 = sld [smem:[#allocation11_spill]] }
 0x34f   : > { %s2411_s11 = sld [smem:[#allocation13_spill]]  ;;  %s2412_s30 = smov %s2097_s10 }
 0x354   : > { %p21_p11 = scmp.ge.s32.totalorder %s2409_s12, 4   ;;  %s2413_s10 = smov %s2410_s16 }
 0x356   :  { %23 = sbr.rel (!%p21_p11) target bundleno = 5 (0x5), region = 100 }
 0x35d   :  { %1431 = vsyncpa [#allocation3], 1 }
 0x35e   :  { %1433 = vsyncpa [#allocation3 + $0x1], 1 }
 0x35f   :  { %1434 = vsyncpa [#allocation6], 1 }
 0x360   :  { %1435 = vsyncpa [#allocation4], 1 }
 0x361   :  { %1437 = vsyncpa [#allocation4 + $0x1], 1 }

</bundles_post_ra>
